<compile_context>
chip_gen: v5e
topology: v5e:2x2
jax: 0.10.0
libtpu: 0.0.40
codegen_flags: <defaults>
</compile_context>

<pallas_src>
import functools

import jax
import jax.numpy as jnp
from jax import lax
from jax.experimental import pallas as pl
from jax.experimental.pallas import tpu as pltpu  # noqa: F401  (TPU-specific tuning hooks)

# ----------------------------- config (small synthetic Llama) -----------------------------
VOCAB = 256
HIDDEN = 64
N_HEADS = 4
N_KV_HEADS = 2
HEAD_DIM = HIDDEN // N_HEADS          # 16
HALF = HEAD_DIM // 2                  # 8
INTERMEDIATE = 128
N_LAYERS = 2
EPS = 1e-5
ROPE_THETA = 10000.0
REP = N_HEADS // N_KV_HEADS           # GQA replication factor

Q_OFF = 0
K_OFF = N_HEADS * HEAD_DIM                    # 64
V_OFF = K_OFF + N_KV_HEADS * HEAD_DIM         # 96
QKV_DIM = V_OFF + N_KV_HEADS * HEAD_DIM       # 128


def _spec(shape):
    """Whole-array single-block BlockSpec (no grid)."""
    return pl.BlockSpec(shape, lambda: (0,) * len(shape))


def _rms_norm(x, w):
    var = jnp.mean(x * x, axis=-1, keepdims=True)
    return (x * lax.rsqrt(var + EPS)) * w


# ------------------------------ fully fused forward kernel --------------------------------
def _llama_fwd_kernel(h_ref, bias_ref, cos_ref, sin_ref,
                      attn_norm_ref, wqkv_ref, wo_ref,
                      mlp_norm_ref, wgu_ref, wdown_ref,
                      final_norm_ref, lm_head_ref,
                      o_ref, *, bs):
    h = h_ref[...]                      # [BS, D] f32 residual stream; stays in VMEM all forward
    bias = bias_ref[...]                # [REP*BS, BS] additive mask (causal + padding + batch)
    cos = cos_ref[...]                  # [REP*BS, Dh]
    sin = sin_ref[...]                  # [REP*BS, Dh]  (rotate-half sign folded in)
    scale = 1.0 / (HEAD_DIM ** 0.5)
    contract_t = (((1,), (1,)), ((), ()))   # a @ b.T without materializing a transpose

    def rope(x, n_rows):
        # HF rotate-half RoPE: out = x*cos + [x2, x1]*sin_signed  (sign folded into sin table).
        rot = jnp.concatenate([x[:, HALF:], x[:, :HALF]], axis=-1)
        return x * cos[:n_rows] + rot * sin[:n_rows]

    # N_LAYERS is a tiny compile-time constant -> static unroll keeps the whole forward in one
    # kernel (a lax.fori_loop over the stacked leading axis would work identically at scale).
    for l in range(N_LAYERS):
        # ------------------------------ attention block ------------------------------
        xn = _rms_norm(h, attn_norm_ref[l]).astype(jnp.bfloat16)
        qkv = jnp.dot(xn, wqkv_ref[l], preferred_element_type=jnp.float32)   # [BS, 128]

        ctx_parts = []
        for j in range(N_KV_HEADS):
            # Stack the REP query heads of this KV group on the sublane axis: [REP*BS, Dh].
            q_blk = jnp.concatenate(
                [qkv[:, Q_OFF + (j * REP + r) * HEAD_DIM:
                        Q_OFF + (j * REP + r + 1) * HEAD_DIM] for r in range(REP)],
                axis=0)
            k_blk = qkv[:, K_OFF + j * HEAD_DIM:K_OFF + (j + 1) * HEAD_DIM]  # [BS, Dh]
            v_blk = qkv[:, V_OFF + j * HEAD_DIM:V_OFF + (j + 1) * HEAD_DIM]  # [BS, Dh]

            q_rot = rope(q_blk, REP * bs).astype(jnp.bfloat16)               # cast once
            k_rot = rope(k_blk, bs).astype(jnp.bfloat16)
            v_b = v_blk.astype(jnp.bfloat16)

            # One depth-16 score contraction for all REP query heads of this KV head.
            s = lax.dot_general(q_rot, k_rot, contract_t,
                                preferred_element_type=jnp.float32)          # [REP*BS, BS]
            s = s * scale + bias

            m = jnp.max(s, axis=-1, keepdims=True)
            p = jnp.exp(s - m)
            p = p / jnp.sum(p, axis=-1, keepdims=True)                       # exact softmax

            ctx_j = jnp.dot(p.astype(jnp.bfloat16), v_b,
                            preferred_element_type=jnp.float32)              # [REP*BS, Dh]
            for r in range(REP):                                             # back to head order
                ctx_parts.append(ctx_j[r * bs:(r + 1) * bs, :])

        # Lane-concat per-head outputs -> single o-proj matmul + single residual add.
        ctx = jnp.concatenate(ctx_parts, axis=-1).astype(jnp.bfloat16)       # [BS, H*Dh]
        h = h + jnp.dot(ctx, wo_ref[l], preferred_element_type=jnp.float32)

        # --------------------------------- MLP block ---------------------------------
        xn = _rms_norm(h, mlp_norm_ref[l]).astype(jnp.bfloat16)
        gu = jnp.dot(xn, wgu_ref[l], preferred_element_type=jnp.float32)     # [BS, 2*I]
        g = gu[:, :INTERMEDIATE]
        u = gu[:, INTERMEDIATE:]
        act = ((g * lax.logistic(g)) * u).astype(jnp.bfloat16)               # SwiGLU (f32 math)
        h = h + jnp.dot(act, wdown_ref[l], preferred_element_type=jnp.float32)

    # ------------------------------ final norm + LM head -----------------------------
    xn = _rms_norm(h, final_norm_ref[...]).astype(jnp.bfloat16)
    o_ref[...] = jnp.dot(xn, lm_head_ref[...], preferred_element_type=jnp.float32)  # [BS, 256]


# --------------------------------------- forward -------------------------------------------
def llama_forward(params, input_ids, attention_mask):
    """input_ids: [B, S] int32, attention_mask: [B, S] int32 -> logits [B, S, VOCAB] f32."""
    B, S = input_ids.shape
    bs = B * S

    # Token-embedding gather stays as XLA glue.
    h = jnp.take(params["embed"], input_ids.reshape(-1), axis=0)             # [BS, D] f32

    # RoPE tables at full HEAD_DIM width, rotate-half sign folded into the sin table,
    # tiled to the [REP*BS, Dh] sublane-stacked layout used inside the kernel.
    inv_freq = 1.0 / (ROPE_THETA ** (jnp.arange(0, HALF, dtype=jnp.float32) / HALF))
    ang = jnp.arange(S, dtype=jnp.float32)[:, None] * inv_freq[None, :]      # [S, HALF]
    cos = jnp.tile(jnp.concatenate([jnp.cos(ang), jnp.cos(ang)], axis=-1), (B * REP, 1))
    sin = jnp.tile(jnp.concatenate([-jnp.sin(ang), jnp.sin(ang)], axis=-1), (B * REP, 1))

    # Additive attention bias (same-sequence AND causal AND key-not-padded).  Identical for
    # every layer and head, so it is built once here (no per-layer iota / div / mod in-kernel).
    q_idx = jnp.arange(bs, dtype=jnp.int32)
    k_idx = jnp.arange(bs, dtype=jnp.int32)
    same_b = (q_idx[:, None] // S) == (k_idx[None, :] // S)
    causal = (k_idx[None, :] % S) <= (q_idx[:, None] % S)
    key_ok = attention_mask.reshape(1, bs) > 0
    valid = same_b & causal & key_ok
    bias = jnp.where(valid, 0.0, -1e9).astype(jnp.float32)                   # [BS, BS]
    bias = jnp.tile(bias, (REP, 1))                                          # [REP*BS, BS]

    operands = (h, bias, cos, sin,
                params["attn_norm"], params["wqkv"], params["wo"],
                params["mlp_norm"], params["w_gate_up"], params["w_down"],
                params["final_norm"], params["lm_head"])

    logits = pl.pallas_call(
        functools.partial(_llama_fwd_kernel, bs=bs),
        out_shape=jax.ShapeDtypeStruct((bs, VOCAB), jnp.float32),
        in_specs=[_spec(x.shape) for x in operands],
        out_specs=_spec((bs, VOCAB)),
    )(*operands)

    return logits.reshape(B, S, VOCAB)


# ----------------------------------- deterministic params ----------------------------------
def init_params(key):
    def dense(k, shape, scale=0.02):
        return (scale * jax.random.normal(k, shape)).astype(jnp.float32)

    keys = jax.random.split(key, 2 + N_LAYERS)
    wqkv, wo, wgu, wdown = [], [], [], []
    for i in range(N_LAYERS):
        lk = jax.random.split(keys[2 + i], 7)
        wq = dense(lk[0], (HIDDEN, N_HEADS * HEAD_DIM))
        wk = dense(lk[1], (HIDDEN, N_KV_HEADS * HEAD_DIM))
        wv = dense(lk[2], (HIDDEN, N_KV_HEADS * HEAD_DIM))
        wqkv.append(jnp.concatenate([wq, wk, wv], axis=1))                   # [64, 128]
        wo.append(dense(lk[3], (N_HEADS * HEAD_DIM, HIDDEN)))                # [64, 64]
        w_gate = dense(lk[4], (HIDDEN, INTERMEDIATE))
        w_up = dense(lk[5], (HIDDEN, INTERMEDIATE))
        wgu.append(jnp.concatenate([w_gate, w_up], axis=1))                  # [64, 256]
        wdown.append(dense(lk[6], (INTERMEDIATE, HIDDEN)))                   # [128, 64]

    return {
        "embed": dense(keys[0], (VOCAB, HIDDEN)),
        "lm_head": dense(keys[1], (HIDDEN, VOCAB)).astype(jnp.bfloat16),     # [64, 256]
        "final_norm": jnp.ones((1, HIDDEN), jnp.float32),
        # Per-layer weights stacked along a leading [N_LAYERS, ...] axis (whole-forward fusion).
        "attn_norm": jnp.ones((N_LAYERS, 1, HIDDEN), jnp.float32),
        "mlp_norm": jnp.ones((N_LAYERS, 1, HIDDEN), jnp.float32),
        "wqkv": jnp.stack(wqkv).astype(jnp.bfloat16),                        # [L, 64, 128]
        "wo": jnp.stack(wo).astype(jnp.bfloat16),                            # [L, 64, 64]
        "w_gate_up": jnp.stack(wgu).astype(jnp.bfloat16),                    # [L, 64, 256]
        "w_down": jnp.stack(wdown).astype(jnp.bfloat16),                     # [L, 128, 64]
    }


# ----------------------------------------- main ---------------------------------------------
if __name__ == "__main__":
    B, S = 2, 8
    root = jax.random.PRNGKey(0)
    k_param, k_ids = jax.random.split(root)

    params = init_params(k_param)
    input_ids = jax.random.randint(k_ids, (B, S), 0, VOCAB, dtype=jnp.int32)
    # last two tokens of the second sequence are padding
    attention_mask = jnp.array(
        [[1, 1, 1, 1, 1, 1, 1, 1],
         [1, 1, 1, 1, 1, 1, 0, 0]], dtype=jnp.int32)

    logits = jax.jit(llama_forward)(params, input_ids, attention_mask)
    logits = jax.block_until_ready(logits)

    assert logits.shape == (B, S, VOCAB), logits.shape
    assert logits.dtype == jnp.float32
    assert bool(jnp.all(jnp.isfinite(logits)))
    print("KERNEL_OK")
</pallas_src>

<mosaic_0001>
module attributes {stable_mosaic.version = 11 : i64} {
  func.func @_llama_fwd_kernel(%arg0: memref<16x64xf32, #tpu.memory_space<vmem>>, %arg1: memref<32x16xf32, #tpu.memory_space<vmem>>, %arg2: memref<32x16xf32, #tpu.memory_space<vmem>>, %arg3: memref<32x16xf32, #tpu.memory_space<vmem>>, %arg4: memref<2x1x64xf32, #tpu.memory_space<vmem>>, %arg5: memref<2x64x128xbf16, #tpu.memory_space<vmem>>, %arg6: memref<2x64x64xbf16, #tpu.memory_space<vmem>>, %arg7: memref<2x1x64xf32, #tpu.memory_space<vmem>>, %arg8: memref<2x64x256xbf16, #tpu.memory_space<vmem>>, %arg9: memref<2x128x64xbf16, #tpu.memory_space<vmem>>, %arg10: memref<1x64xf32, #tpu.memory_space<vmem>>, %arg11: memref<64x256xbf16, #tpu.memory_space<vmem>>, %arg12: memref<16x256xf32, #tpu.memory_space<vmem>>) attributes {dimension_semantics = [], scalar_prefetch = 0 : i64, scratch_operands = 0 : i64, tpu.core_type = #tpu.core_type<tc>} {
    %c0 = arith.constant 0 : index
    %c0_0 = arith.constant 0 : index
    %0 = vector.load %arg0[%c0, %c0_0] : memref<16x64xf32, #tpu.memory_space<vmem>>, vector<16x64xf32>
    %c0_1 = arith.constant 0 : index
    %c0_2 = arith.constant 0 : index
    %1 = vector.load %arg1[%c0_1, %c0_2] : memref<32x16xf32, #tpu.memory_space<vmem>>, vector<32x16xf32>
    %c0_3 = arith.constant 0 : index
    %c0_4 = arith.constant 0 : index
    %2 = vector.load %arg2[%c0_3, %c0_4] : memref<32x16xf32, #tpu.memory_space<vmem>>, vector<32x16xf32>
    %c0_5 = arith.constant 0 : index
    %c0_6 = arith.constant 0 : index
    %3 = vector.load %arg3[%c0_5, %c0_6] : memref<32x16xf32, #tpu.memory_space<vmem>>, vector<32x16xf32>
    %c0_7 = arith.constant 0 : index
    %c0_8 = arith.constant 0 : index
    %c0_9 = arith.constant 0 : index
    %4 = vector.load %arg4[%c0_7, %c0_8, %c0_9] : memref<2x1x64xf32, #tpu.memory_space<vmem>>, vector<1x1x64xf32>
    %5 = vector.shape_cast %4 : vector<1x1x64xf32> to vector<1x64xf32>
    %6 = arith.mulf %0, %0 : vector<16x64xf32>
    %cst = arith.constant dense<0.000000e+00> : vector<16xf32>
    %7 = vector.multi_reduction <add>, %6, %cst [1] : vector<16x64xf32> to vector<16xf32>
    %8 = vector.shape_cast %7 : vector<16xf32> to vector<16x1xf32>
    %cst_10 = arith.constant 6.400000e+01 : f32
    %9 = vector.broadcast %cst_10 : f32 to vector<16x1xf32>
    %10 = arith.divf %8, %9 : vector<16x1xf32>
    %cst_11 = arith.constant 9.99999974E-6 : f32
    %11 = vector.broadcast %cst_11 : f32 to vector<16x1xf32>
    %12 = arith.addf %10, %11 : vector<16x1xf32>
    %13 = math.rsqrt %12 : vector<16x1xf32>
    %14 = vector.broadcast %13 : vector<16x1xf32> to vector<16x64xf32>
    %15 = arith.mulf %0, %14 : vector<16x64xf32>
    %16 = vector.broadcast %5 : vector<1x64xf32> to vector<16x64xf32>
    %17 = arith.mulf %15, %16 : vector<16x64xf32>
    %18 = arith.truncf %17 : vector<16x64xf32> to vector<16x64xbf16>
    %c0_12 = arith.constant 0 : index
    %c0_13 = arith.constant 0 : index
    %c0_14 = arith.constant 0 : index
    %19 = vector.load %arg5[%c0_12, %c0_13, %c0_14] : memref<2x64x128xbf16, #tpu.memory_space<vmem>>, vector<1x64x128xbf16>
    %20 = vector.shape_cast %19 : vector<1x64x128xbf16> to vector<64x128xbf16>
    %cst_15 = arith.constant dense<0.000000e+00> : vector<16x128xf32>
    %21 = tpu.matmul %18, %20, %cst_15 {dimension_numbers = #tpu.dot_dimension_numbers<[1], [0], [0], [1], [0, 0, 1, 1], [], []>} : vector<16x64xbf16>, vector<64x128xbf16>, vector<16x128xf32> -> vector<16x128xf32>
    %22 = vector.extract_strided_slice %21 {offsets = [0, 0], sizes = [16, 16], strides = [1, 1]} : vector<16x128xf32> to vector<16x16xf32>
    %23 = vector.extract_strided_slice %21 {offsets = [0, 16], sizes = [16, 16], strides = [1, 1]} : vector<16x128xf32> to vector<16x16xf32>
    %24 = tpu.concatenate %22, %23 in 0 : vector<16x16xf32>, vector<16x16xf32> -> vector<32x16xf32>
    %25 = vector.extract_strided_slice %21 {offsets = [0, 64], sizes = [16, 16], strides = [1, 1]} : vector<16x128xf32> to vector<16x16xf32>
    %26 = vector.extract_strided_slice %21 {offsets = [0, 96], sizes = [16, 16], strides = [1, 1]} : vector<16x128xf32> to vector<16x16xf32>
    %27 = vector.extract_strided_slice %24 {offsets = [0, 8], sizes = [32, 8], strides = [1, 1]} : vector<32x16xf32> to vector<32x8xf32>
    %28 = vector.extract_strided_slice %24 {offsets = [0, 0], sizes = [32, 8], strides = [1, 1]} : vector<32x16xf32> to vector<32x8xf32>
    %29 = tpu.concatenate %27, %28 in 1 : vector<32x8xf32>, vector<32x8xf32> -> vector<32x16xf32>
    %30 = arith.mulf %24, %2 : vector<32x16xf32>
    %31 = arith.mulf %29, %3 : vector<32x16xf32>
    %32 = arith.addf %30, %31 : vector<32x16xf32>
    %33 = arith.truncf %32 : vector<32x16xf32> to vector<32x16xbf16>
    %34 = vector.extract_strided_slice %25 {offsets = [0, 8], sizes = [16, 8], strides = [1, 1]} : vector<16x16xf32> to vector<16x8xf32>
    %35 = vector.extract_strided_slice %25 {offsets = [0, 0], sizes = [16, 8], strides = [1, 1]} : vector<16x16xf32> to vector<16x8xf32>
    %36 = tpu.concatenate %34, %35 in 1 : vector<16x8xf32>, vector<16x8xf32> -> vector<16x16xf32>
    %37 = vector.extract_strided_slice %2 {offsets = [0, 0], sizes = [16, 16], strides = [1, 1]} : vector<32x16xf32> to vector<16x16xf32>
    %38 = arith.mulf %25, %37 : vector<16x16xf32>
    %39 = vector.extract_strided_slice %3 {offsets = [0, 0], sizes = [16, 16], strides = [1, 1]} : vector<32x16xf32> to vector<16x16xf32>
    %40 = arith.mulf %36, %39 : vector<16x16xf32>
    %41 = arith.addf %38, %40 : vector<16x16xf32>
    %42 = arith.truncf %41 : vector<16x16xf32> to vector<16x16xbf16>
    %43 = arith.truncf %26 : vector<16x16xf32> to vector<16x16xbf16>
    %cst_16 = arith.constant dense<0.000000e+00> : vector<32x16xf32>
    %44 = tpu.matmul %33, %42, %cst_16 {dimension_numbers = #tpu.dot_dimension_numbers<[1], [1], [0], [0], [0, 0, 1, 0], [], []>} : vector<32x16xbf16>, vector<16x16xbf16>, vector<32x16xf32> -> vector<32x16xf32>
    %cst_17 = arith.constant 2.500000e-01 : f32
    %45 = vector.broadcast %cst_17 : f32 to vector<32x16xf32>
    %46 = arith.mulf %44, %45 : vector<32x16xf32>
    %47 = arith.addf %46, %1 : vector<32x16xf32>
    %cst_18 = arith.constant dense<0xFF800000> : vector<32xf32>
    %48 = vector.multi_reduction <maximumf>, %47, %cst_18 [1] : vector<32x16xf32> to vector<32xf32>
    %49 = vector.shape_cast %48 : vector<32xf32> to vector<32x1xf32>
    %50 = vector.broadcast %49 : vector<32x1xf32> to vector<32x16xf32>
    %51 = arith.subf %47, %50 : vector<32x16xf32>
    %52 = math.exp %51 : vector<32x16xf32>
    %cst_19 = arith.constant dense<0.000000e+00> : vector<32xf32>
    %53 = vector.multi_reduction <add>, %52, %cst_19 [1] : vector<32x16xf32> to vector<32xf32>
    %54 = vector.shape_cast %53 : vector<32xf32> to vector<32x1xf32>
    %55 = vector.broadcast %54 : vector<32x1xf32> to vector<32x16xf32>
    %56 = arith.divf %52, %55 : vector<32x16xf32>
    %57 = arith.truncf %56 : vector<32x16xf32> to vector<32x16xbf16>
    %cst_20 = arith.constant dense<0.000000e+00> : vector<32x16xf32>
    %58 = tpu.matmul %57, %43, %cst_20 {dimension_numbers = #tpu.dot_dimension_numbers<[1], [0], [0], [1], [0, 0, 1, 1], [], []>} : vector<32x16xbf16>, vector<16x16xbf16>, vector<32x16xf32> -> vector<32x16xf32>
    %59 = vector.extract_strided_slice %58 {offsets = [0, 0], sizes = [16, 16], strides = [1, 1]} : vector<32x16xf32> to vector<16x16xf32>
    %60 = vector.extract_strided_slice %58 {offsets = [16, 0], sizes = [16, 16], strides = [1, 1]} : vector<32x16xf32> to vector<16x16xf32>
    %61 = vector.extract_strided_slice %21 {offsets = [0, 32], sizes = [16, 16], strides = [1, 1]} : vector<16x128xf32> to vector<16x16xf32>
    %62 = vector.extract_strided_slice %21 {offsets = [0, 48], sizes = [16, 16], strides = [1, 1]} : vector<16x128xf32> to vector<16x16xf32>
    %63 = tpu.concatenate %61, %62 in 0 : vector<16x16xf32>, vector<16x16xf32> -> vector<32x16xf32>
    %64 = vector.extract_strided_slice %21 {offsets = [0, 80], sizes = [16, 16], strides = [1, 1]} : vector<16x128xf32> to vector<16x16xf32>
    %65 = vector.extract_strided_slice %21 {offsets = [0, 112], sizes = [16, 16], strides = [1, 1]} : vector<16x128xf32> to vector<16x16xf32>
    %66 = vector.extract_strided_slice %63 {offsets = [0, 8], sizes = [32, 8], strides = [1, 1]} : vector<32x16xf32> to vector<32x8xf32>
    %67 = vector.extract_strided_slice %63 {offsets = [0, 0], sizes = [32, 8], strides = [1, 1]} : vector<32x16xf32> to vector<32x8xf32>
    %68 = tpu.concatenate %66, %67 in 1 : vector<32x8xf32>, vector<32x8xf32> -> vector<32x16xf32>
    %69 = arith.mulf %63, %2 : vector<32x16xf32>
    %70 = arith.mulf %68, %3 : vector<32x16xf32>
    %71 = arith.addf %69, %70 : vector<32x16xf32>
    %72 = arith.truncf %71 : vector<32x16xf32> to vector<32x16xbf16>
    %73 = vector.extract_strided_slice %64 {offsets = [0, 8], sizes = [16, 8], strides = [1, 1]} : vector<16x16xf32> to vector<16x8xf32>
    %74 = vector.extract_strided_slice %64 {offsets = [0, 0], sizes = [16, 8], strides = [1, 1]} : vector<16x16xf32> to vector<16x8xf32>
    %75 = tpu.concatenate %73, %74 in 1 : vector<16x8xf32>, vector<16x8xf32> -> vector<16x16xf32>
    %76 = vector.extract_strided_slice %2 {offsets = [0, 0], sizes = [16, 16], strides = [1, 1]} : vector<32x16xf32> to vector<16x16xf32>
    %77 = arith.mulf %64, %76 : vector<16x16xf32>
    %78 = vector.extract_strided_slice %3 {offsets = [0, 0], sizes = [16, 16], strides = [1, 1]} : vector<32x16xf32> to vector<16x16xf32>
    %79 = arith.mulf %75, %78 : vector<16x16xf32>
    %80 = arith.addf %77, %79 : vector<16x16xf32>
    %81 = arith.truncf %80 : vector<16x16xf32> to vector<16x16xbf16>
    %82 = arith.truncf %65 : vector<16x16xf32> to vector<16x16xbf16>
    %cst_21 = arith.constant dense<0.000000e+00> : vector<32x16xf32>
    %83 = tpu.matmul %72, %81, %cst_21 {dimension_numbers = #tpu.dot_dimension_numbers<[1], [1], [0], [0], [0, 0, 1, 0], [], []>} : vector<32x16xbf16>, vector<16x16xbf16>, vector<32x16xf32> -> vector<32x16xf32>
    %cst_22 = arith.constant 2.500000e-01 : f32
    %84 = vector.broadcast %cst_22 : f32 to vector<32x16xf32>
    %85 = arith.mulf %83, %84 : vector<32x16xf32>
    %86 = arith.addf %85, %1 : vector<32x16xf32>
    %cst_23 = arith.constant dense<0xFF800000> : vector<32xf32>
    %87 = vector.multi_reduction <maximumf>, %86, %cst_23 [1] : vector<32x16xf32> to vector<32xf32>
    %88 = vector.shape_cast %87 : vector<32xf32> to vector<32x1xf32>
    %89 = vector.broadcast %88 : vector<32x1xf32> to vector<32x16xf32>
    %90 = arith.subf %86, %89 : vector<32x16xf32>
    %91 = math.exp %90 : vector<32x16xf32>
    %cst_24 = arith.constant dense<0.000000e+00> : vector<32xf32>
    %92 = vector.multi_reduction <add>, %91, %cst_24 [1] : vector<32x16xf32> to vector<32xf32>
    %93 = vector.shape_cast %92 : vector<32xf32> to vector<32x1xf32>
    %94 = vector.broadcast %93 : vector<32x1xf32> to vector<32x16xf32>
    %95 = arith.divf %91, %94 : vector<32x16xf32>
    %96 = arith.truncf %95 : vector<32x16xf32> to vector<32x16xbf16>
    %cst_25 = arith.constant dense<0.000000e+00> : vector<32x16xf32>
    %97 = tpu.matmul %96, %82, %cst_25 {dimension_numbers = #tpu.dot_dimension_numbers<[1], [0], [0], [1], [0, 0, 1, 1], [], []>} : vector<32x16xbf16>, vector<16x16xbf16>, vector<32x16xf32> -> vector<32x16xf32>
    %98 = vector.extract_strided_slice %97 {offsets = [0, 0], sizes = [16, 16], strides = [1, 1]} : vector<32x16xf32> to vector<16x16xf32>
    %99 = vector.extract_strided_slice %97 {offsets = [16, 0], sizes = [16, 16], strides = [1, 1]} : vector<32x16xf32> to vector<16x16xf32>
    %100 = tpu.concatenate %59, %60, %98, %99 in 1 : vector<16x16xf32>, vector<16x16xf32>, vector<16x16xf32>, vector<16x16xf32> -> vector<16x64xf32>
    %101 = arith.truncf %100 : vector<16x64xf32> to vector<16x64xbf16>
    %c0_26 = arith.constant 0 : index
    %c0_27 = arith.constant 0 : index
    %c0_28 = arith.constant 0 : index
    %102 = vector.load %arg6[%c0_26, %c0_27, %c0_28] : memref<2x64x64xbf16, #tpu.memory_space<vmem>>, vector<1x64x64xbf16>
    %103 = vector.shape_cast %102 : vector<1x64x64xbf16> to vector<64x64xbf16>
    %cst_29 = arith.constant dense<0.000000e+00> : vector<16x64xf32>
    %104 = tpu.matmul %101, %103, %cst_29 {dimension_numbers = #tpu.dot_dimension_numbers<[1], [0], [0], [1], [0, 0, 1, 1], [], []>} : vector<16x64xbf16>, vector<64x64xbf16>, vector<16x64xf32> -> vector<16x64xf32>
    %105 = arith.addf %0, %104 : vector<16x64xf32>
    %c0_30 = arith.constant 0 : index
    %c0_31 = arith.constant 0 : index
    %c0_32 = arith.constant 0 : index
    %106 = vector.load %arg7[%c0_30, %c0_31, %c0_32] : memref<2x1x64xf32, #tpu.memory_space<vmem>>, vector<1x1x64xf32>
    %107 = vector.shape_cast %106 : vector<1x1x64xf32> to vector<1x64xf32>
    %108 = arith.mulf %105, %105 : vector<16x64xf32>
    %cst_33 = arith.constant dense<0.000000e+00> : vector<16xf32>
    %109 = vector.multi_reduction <add>, %108, %cst_33 [1] : vector<16x64xf32> to vector<16xf32>
    %110 = vector.shape_cast %109 : vector<16xf32> to vector<16x1xf32>
    %cst_34 = arith.constant 6.400000e+01 : f32
    %111 = vector.broadcast %cst_34 : f32 to vector<16x1xf32>
    %112 = arith.divf %110, %111 : vector<16x1xf32>
    %cst_35 = arith.constant 9.99999974E-6 : f32
    %113 = vector.broadcast %cst_35 : f32 to vector<16x1xf32>
    %114 = arith.addf %112, %113 : vector<16x1xf32>
    %115 = math.rsqrt %114 : vector<16x1xf32>
    %116 = vector.broadcast %115 : vector<16x1xf32> to vector<16x64xf32>
    %117 = arith.mulf %105, %116 : vector<16x64xf32>
    %118 = vector.broadcast %107 : vector<1x64xf32> to vector<16x64xf32>
    %119 = arith.mulf %117, %118 : vector<16x64xf32>
    %120 = arith.truncf %119 : vector<16x64xf32> to vector<16x64xbf16>
    %c0_36 = arith.constant 0 : index
    %c0_37 = arith.constant 0 : index
    %c0_38 = arith.constant 0 : index
    %121 = vector.load %arg8[%c0_36, %c0_37, %c0_38] : memref<2x64x256xbf16, #tpu.memory_space<vmem>>, vector<1x64x256xbf16>
    %122 = vector.shape_cast %121 : vector<1x64x256xbf16> to vector<64x256xbf16>
    %cst_39 = arith.constant dense<0.000000e+00> : vector<16x256xf32>
    %123 = tpu.matmul %120, %122, %cst_39 {dimension_numbers = #tpu.dot_dimension_numbers<[1], [0], [0], [1], [0, 0, 1, 1], [], []>} : vector<16x64xbf16>, vector<64x256xbf16>, vector<16x256xf32> -> vector<16x256xf32>
    %124 = vector.extract_strided_slice %123 {offsets = [0, 0], sizes = [16, 128], strides = [1, 1]} : vector<16x256xf32> to vector<16x128xf32>
    %125 = vector.extract_strided_slice %123 {offsets = [0, 128], sizes = [16, 128], strides = [1, 1]} : vector<16x256xf32> to vector<16x128xf32>
    %126 = arith.negf %124 : vector<16x128xf32>
    %127 = math.exp %126 : vector<16x128xf32>
    %cst_40 = arith.constant 1.000000e+00 : f32
    %128 = vector.broadcast %cst_40 : f32 to vector<16x128xf32>
    %129 = arith.addf %128, %127 : vector<16x128xf32>
    %130 = arith.divf %128, %129 : vector<16x128xf32>
    %131 = arith.mulf %124, %130 : vector<16x128xf32>
    %132 = arith.mulf %131, %125 : vector<16x128xf32>
    %133 = arith.truncf %132 : vector<16x128xf32> to vector<16x128xbf16>
    %c0_41 = arith.constant 0 : index
    %c0_42 = arith.constant 0 : index
    %c0_43 = arith.constant 0 : index
    %134 = vector.load %arg9[%c0_41, %c0_42, %c0_43] : memref<2x128x64xbf16, #tpu.memory_space<vmem>>, vector<1x128x64xbf16>
    %135 = vector.shape_cast %134 : vector<1x128x64xbf16> to vector<128x64xbf16>
    %cst_44 = arith.constant dense<0.000000e+00> : vector<16x64xf32>
    %136 = tpu.matmul %133, %135, %cst_44 {dimension_numbers = #tpu.dot_dimension_numbers<[1], [0], [0], [1], [0, 0, 1, 1], [], []>} : vector<16x128xbf16>, vector<128x64xbf16>, vector<16x64xf32> -> vector<16x64xf32>
    %137 = arith.addf %105, %136 : vector<16x64xf32>
    %c1 = arith.constant 1 : index
    %c0_45 = arith.constant 0 : index
    %c0_46 = arith.constant 0 : index
    %138 = vector.load %arg4[%c1, %c0_45, %c0_46] : memref<2x1x64xf32, #tpu.memory_space<vmem>>, vector<1x1x64xf32>
    %139 = vector.shape_cast %138 : vector<1x1x64xf32> to vector<1x64xf32>
    %140 = arith.mulf %137, %137 : vector<16x64xf32>
    %cst_47 = arith.constant dense<0.000000e+00> : vector<16xf32>
    %141 = vector.multi_reduction <add>, %140, %cst_47 [1] : vector<16x64xf32> to vector<16xf32>
    %142 = vector.shape_cast %141 : vector<16xf32> to vector<16x1xf32>
    %cst_48 = arith.constant 6.400000e+01 : f32
    %143 = vector.broadcast %cst_48 : f32 to vector<16x1xf32>
    %144 = arith.divf %142, %143 : vector<16x1xf32>
    %cst_49 = arith.constant 9.99999974E-6 : f32
    %145 = vector.broadcast %cst_49 : f32 to vector<16x1xf32>
    %146 = arith.addf %144, %145 : vector<16x1xf32>
    %147 = math.rsqrt %146 : vector<16x1xf32>
    %148 = vector.broadcast %147 : vector<16x1xf32> to vector<16x64xf32>
    %149 = arith.mulf %137, %148 : vector<16x64xf32>
    %150 = vector.broadcast %139 : vector<1x64xf32> to vector<16x64xf32>
    %151 = arith.mulf %149, %150 : vector<16x64xf32>
    %152 = arith.truncf %151 : vector<16x64xf32> to vector<16x64xbf16>
    %c1_50 = arith.constant 1 : index
    %c0_51 = arith.constant 0 : index
    %c0_52 = arith.constant 0 : index
    %153 = vector.load %arg5[%c1_50, %c0_51, %c0_52] : memref<2x64x128xbf16, #tpu.memory_space<vmem>>, vector<1x64x128xbf16>
    %154 = vector.shape_cast %153 : vector<1x64x128xbf16> to vector<64x128xbf16>
    %cst_53 = arith.constant dense<0.000000e+00> : vector<16x128xf32>
    %155 = tpu.matmul %152, %154, %cst_53 {dimension_numbers = #tpu.dot_dimension_numbers<[1], [0], [0], [1], [0, 0, 1, 1], [], []>} : vector<16x64xbf16>, vector<64x128xbf16>, vector<16x128xf32> -> vector<16x128xf32>
    %156 = vector.extract_strided_slice %155 {offsets = [0, 0], sizes = [16, 16], strides = [1, 1]} : vector<16x128xf32> to vector<16x16xf32>
    %157 = vector.extract_strided_slice %155 {offsets = [0, 16], sizes = [16, 16], strides = [1, 1]} : vector<16x128xf32> to vector<16x16xf32>
    %158 = tpu.concatenate %156, %157 in 0 : vector<16x16xf32>, vector<16x16xf32> -> vector<32x16xf32>
    %159 = vector.extract_strided_slice %155 {offsets = [0, 64], sizes = [16, 16], strides = [1, 1]} : vector<16x128xf32> to vector<16x16xf32>
    %160 = vector.extract_strided_slice %155 {offsets = [0, 96], sizes = [16, 16], strides = [1, 1]} : vector<16x128xf32> to vector<16x16xf32>
    %161 = vector.extract_strided_slice %158 {offsets = [0, 8], sizes = [32, 8], strides = [1, 1]} : vector<32x16xf32> to vector<32x8xf32>
    %162 = vector.extract_strided_slice %158 {offsets = [0, 0], sizes = [32, 8], strides = [1, 1]} : vector<32x16xf32> to vector<32x8xf32>
    %163 = tpu.concatenate %161, %162 in 1 : vector<32x8xf32>, vector<32x8xf32> -> vector<32x16xf32>
    %164 = arith.mulf %158, %2 : vector<32x16xf32>
    %165 = arith.mulf %163, %3 : vector<32x16xf32>
    %166 = arith.addf %164, %165 : vector<32x16xf32>
    %167 = arith.truncf %166 : vector<32x16xf32> to vector<32x16xbf16>
    %168 = vector.extract_strided_slice %159 {offsets = [0, 8], sizes = [16, 8], strides = [1, 1]} : vector<16x16xf32> to vector<16x8xf32>
    %169 = vector.extract_strided_slice %159 {offsets = [0, 0], sizes = [16, 8], strides = [1, 1]} : vector<16x16xf32> to vector<16x8xf32>
    %170 = tpu.concatenate %168, %169 in 1 : vector<16x8xf32>, vector<16x8xf32> -> vector<16x16xf32>
    %171 = vector.extract_strided_slice %2 {offsets = [0, 0], sizes = [16, 16], strides = [1, 1]} : vector<32x16xf32> to vector<16x16xf32>
    %172 = arith.mulf %159, %171 : vector<16x16xf32>
    %173 = vector.extract_strided_slice %3 {offsets = [0, 0], sizes = [16, 16], strides = [1, 1]} : vector<32x16xf32> to vector<16x16xf32>
    %174 = arith.mulf %170, %173 : vector<16x16xf32>
    %175 = arith.addf %172, %174 : vector<16x16xf32>
    %176 = arith.truncf %175 : vector<16x16xf32> to vector<16x16xbf16>
    %177 = arith.truncf %160 : vector<16x16xf32> to vector<16x16xbf16>
    %cst_54 = arith.constant dense<0.000000e+00> : vector<32x16xf32>
    %178 = tpu.matmul %167, %176, %cst_54 {dimension_numbers = #tpu.dot_dimension_numbers<[1], [1], [0], [0], [0, 0, 1, 0], [], []>} : vector<32x16xbf16>, vector<16x16xbf16>, vector<32x16xf32> -> vector<32x16xf32>
    %cst_55 = arith.constant 2.500000e-01 : f32
    %179 = vector.broadcast %cst_55 : f32 to vector<32x16xf32>
    %180 = arith.mulf %178, %179 : vector<32x16xf32>
    %181 = arith.addf %180, %1 : vector<32x16xf32>
    %cst_56 = arith.constant dense<0xFF800000> : vector<32xf32>
    %182 = vector.multi_reduction <maximumf>, %181, %cst_56 [1] : vector<32x16xf32> to vector<32xf32>
    %183 = vector.shape_cast %182 : vector<32xf32> to vector<32x1xf32>
    %184 = vector.broadcast %183 : vector<32x1xf32> to vector<32x16xf32>
    %185 = arith.subf %181, %184 : vector<32x16xf32>
    %186 = math.exp %185 : vector<32x16xf32>
    %cst_57 = arith.constant dense<0.000000e+00> : vector<32xf32>
    %187 = vector.multi_reduction <add>, %186, %cst_57 [1] : vector<32x16xf32> to vector<32xf32>
    %188 = vector.shape_cast %187 : vector<32xf32> to vector<32x1xf32>
    %189 = vector.broadcast %188 : vector<32x1xf32> to vector<32x16xf32>
    %190 = arith.divf %186, %189 : vector<32x16xf32>
    %191 = arith.truncf %190 : vector<32x16xf32> to vector<32x16xbf16>
    %cst_58 = arith.constant dense<0.000000e+00> : vector<32x16xf32>
    %192 = tpu.matmul %191, %177, %cst_58 {dimension_numbers = #tpu.dot_dimension_numbers<[1], [0], [0], [1], [0, 0, 1, 1], [], []>} : vector<32x16xbf16>, vector<16x16xbf16>, vector<32x16xf32> -> vector<32x16xf32>
    %193 = vector.extract_strided_slice %192 {offsets = [0, 0], sizes = [16, 16], strides = [1, 1]} : vector<32x16xf32> to vector<16x16xf32>
    %194 = vector.extract_strided_slice %192 {offsets = [16, 0], sizes = [16, 16], strides = [1, 1]} : vector<32x16xf32> to vector<16x16xf32>
    %195 = vector.extract_strided_slice %155 {offsets = [0, 32], sizes = [16, 16], strides = [1, 1]} : vector<16x128xf32> to vector<16x16xf32>
    %196 = vector.extract_strided_slice %155 {offsets = [0, 48], sizes = [16, 16], strides = [1, 1]} : vector<16x128xf32> to vector<16x16xf32>
    %197 = tpu.concatenate %195, %196 in 0 : vector<16x16xf32>, vector<16x16xf32> -> vector<32x16xf32>
    %198 = vector.extract_strided_slice %155 {offsets = [0, 80], sizes = [16, 16], strides = [1, 1]} : vector<16x128xf32> to vector<16x16xf32>
    %199 = vector.extract_strided_slice %155 {offsets = [0, 112], sizes = [16, 16], strides = [1, 1]} : vector<16x128xf32> to vector<16x16xf32>
    %200 = vector.extract_strided_slice %197 {offsets = [0, 8], sizes = [32, 8], strides = [1, 1]} : vector<32x16xf32> to vector<32x8xf32>
    %201 = vector.extract_strided_slice %197 {offsets = [0, 0], sizes = [32, 8], strides = [1, 1]} : vector<32x16xf32> to vector<32x8xf32>
    %202 = tpu.concatenate %200, %201 in 1 : vector<32x8xf32>, vector<32x8xf32> -> vector<32x16xf32>
    %203 = arith.mulf %197, %2 : vector<32x16xf32>
    %204 = arith.mulf %202, %3 : vector<32x16xf32>
    %205 = arith.addf %203, %204 : vector<32x16xf32>
    %206 = arith.truncf %205 : vector<32x16xf32> to vector<32x16xbf16>
    %207 = vector.extract_strided_slice %198 {offsets = [0, 8], sizes = [16, 8], strides = [1, 1]} : vector<16x16xf32> to vector<16x8xf32>
    %208 = vector.extract_strided_slice %198 {offsets = [0, 0], sizes = [16, 8], strides = [1, 1]} : vector<16x16xf32> to vector<16x8xf32>
    %209 = tpu.concatenate %207, %208 in 1 : vector<16x8xf32>, vector<16x8xf32> -> vector<16x16xf32>
    %210 = vector.extract_strided_slice %2 {offsets = [0, 0], sizes = [16, 16], strides = [1, 1]} : vector<32x16xf32> to vector<16x16xf32>
    %211 = arith.mulf %198, %210 : vector<16x16xf32>
    %212 = vector.extract_strided_slice %3 {offsets = [0, 0], sizes = [16, 16], strides = [1, 1]} : vector<32x16xf32> to vector<16x16xf32>
    %213 = arith.mulf %209, %212 : vector<16x16xf32>
    %214 = arith.addf %211, %213 : vector<16x16xf32>
    %215 = arith.truncf %214 : vector<16x16xf32> to vector<16x16xbf16>
    %216 = arith.truncf %199 : vector<16x16xf32> to vector<16x16xbf16>
    %cst_59 = arith.constant dense<0.000000e+00> : vector<32x16xf32>
    %217 = tpu.matmul %206, %215, %cst_59 {dimension_numbers = #tpu.dot_dimension_numbers<[1], [1], [0], [0], [0, 0, 1, 0], [], []>} : vector<32x16xbf16>, vector<16x16xbf16>, vector<32x16xf32> -> vector<32x16xf32>
    %cst_60 = arith.constant 2.500000e-01 : f32
    %218 = vector.broadcast %cst_60 : f32 to vector<32x16xf32>
    %219 = arith.mulf %217, %218 : vector<32x16xf32>
    %220 = arith.addf %219, %1 : vector<32x16xf32>
    %cst_61 = arith.constant dense<0xFF800000> : vector<32xf32>
    %221 = vector.multi_reduction <maximumf>, %220, %cst_61 [1] : vector<32x16xf32> to vector<32xf32>
    %222 = vector.shape_cast %221 : vector<32xf32> to vector<32x1xf32>
    %223 = vector.broadcast %222 : vector<32x1xf32> to vector<32x16xf32>
    %224 = arith.subf %220, %223 : vector<32x16xf32>
    %225 = math.exp %224 : vector<32x16xf32>
    %cst_62 = arith.constant dense<0.000000e+00> : vector<32xf32>
    %226 = vector.multi_reduction <add>, %225, %cst_62 [1] : vector<32x16xf32> to vector<32xf32>
    %227 = vector.shape_cast %226 : vector<32xf32> to vector<32x1xf32>
    %228 = vector.broadcast %227 : vector<32x1xf32> to vector<32x16xf32>
    %229 = arith.divf %225, %228 : vector<32x16xf32>
    %230 = arith.truncf %229 : vector<32x16xf32> to vector<32x16xbf16>
    %cst_63 = arith.constant dense<0.000000e+00> : vector<32x16xf32>
    %231 = tpu.matmul %230, %216, %cst_63 {dimension_numbers = #tpu.dot_dimension_numbers<[1], [0], [0], [1], [0, 0, 1, 1], [], []>} : vector<32x16xbf16>, vector<16x16xbf16>, vector<32x16xf32> -> vector<32x16xf32>
    %232 = vector.extract_strided_slice %231 {offsets = [0, 0], sizes = [16, 16], strides = [1, 1]} : vector<32x16xf32> to vector<16x16xf32>
    %233 = vector.extract_strided_slice %231 {offsets = [16, 0], sizes = [16, 16], strides = [1, 1]} : vector<32x16xf32> to vector<16x16xf32>
    %234 = tpu.concatenate %193, %194, %232, %233 in 1 : vector<16x16xf32>, vector<16x16xf32>, vector<16x16xf32>, vector<16x16xf32> -> vector<16x64xf32>
    %235 = arith.truncf %234 : vector<16x64xf32> to vector<16x64xbf16>
    %c1_64 = arith.constant 1 : index
    %c0_65 = arith.constant 0 : index
    %c0_66 = arith.constant 0 : index
    %236 = vector.load %arg6[%c1_64, %c0_65, %c0_66] : memref<2x64x64xbf16, #tpu.memory_space<vmem>>, vector<1x64x64xbf16>
    %237 = vector.shape_cast %236 : vector<1x64x64xbf16> to vector<64x64xbf16>
    %cst_67 = arith.constant dense<0.000000e+00> : vector<16x64xf32>
    %238 = tpu.matmul %235, %237, %cst_67 {dimension_numbers = #tpu.dot_dimension_numbers<[1], [0], [0], [1], [0, 0, 1, 1], [], []>} : vector<16x64xbf16>, vector<64x64xbf16>, vector<16x64xf32> -> vector<16x64xf32>
    %239 = arith.addf %137, %238 : vector<16x64xf32>
    %c1_68 = arith.constant 1 : index
    %c0_69 = arith.constant 0 : index
    %c0_70 = arith.constant 0 : index
    %240 = vector.load %arg7[%c1_68, %c0_69, %c0_70] : memref<2x1x64xf32, #tpu.memory_space<vmem>>, vector<1x1x64xf32>
    %241 = vector.shape_cast %240 : vector<1x1x64xf32> to vector<1x64xf32>
    %242 = arith.mulf %239, %239 : vector<16x64xf32>
    %cst_71 = arith.constant dense<0.000000e+00> : vector<16xf32>
    %243 = vector.multi_reduction <add>, %242, %cst_71 [1] : vector<16x64xf32> to vector<16xf32>
    %244 = vector.shape_cast %243 : vector<16xf32> to vector<16x1xf32>
    %cst_72 = arith.constant 6.400000e+01 : f32
    %245 = vector.broadcast %cst_72 : f32 to vector<16x1xf32>
    %246 = arith.divf %244, %245 : vector<16x1xf32>
    %cst_73 = arith.constant 9.99999974E-6 : f32
    %247 = vector.broadcast %cst_73 : f32 to vector<16x1xf32>
    %248 = arith.addf %246, %247 : vector<16x1xf32>
    %249 = math.rsqrt %248 : vector<16x1xf32>
    %250 = vector.broadcast %249 : vector<16x1xf32> to vector<16x64xf32>
    %251 = arith.mulf %239, %250 : vector<16x64xf32>
    %252 = vector.broadcast %241 : vector<1x64xf32> to vector<16x64xf32>
    %253 = arith.mulf %251, %252 : vector<16x64xf32>
    %254 = arith.truncf %253 : vector<16x64xf32> to vector<16x64xbf16>
    %c1_74 = arith.constant 1 : index
    %c0_75 = arith.constant 0 : index
    %c0_76 = arith.constant 0 : index
    %255 = vector.load %arg8[%c1_74, %c0_75, %c0_76] : memref<2x64x256xbf16, #tpu.memory_space<vmem>>, vector<1x64x256xbf16>
    %256 = vector.shape_cast %255 : vector<1x64x256xbf16> to vector<64x256xbf16>
    %cst_77 = arith.constant dense<0.000000e+00> : vector<16x256xf32>
    %257 = tpu.matmul %254, %256, %cst_77 {dimension_numbers = #tpu.dot_dimension_numbers<[1], [0], [0], [1], [0, 0, 1, 1], [], []>} : vector<16x64xbf16>, vector<64x256xbf16>, vector<16x256xf32> -> vector<16x256xf32>
    %258 = vector.extract_strided_slice %257 {offsets = [0, 0], sizes = [16, 128], strides = [1, 1]} : vector<16x256xf32> to vector<16x128xf32>
    %259 = vector.extract_strided_slice %257 {offsets = [0, 128], sizes = [16, 128], strides = [1, 1]} : vector<16x256xf32> to vector<16x128xf32>
    %260 = arith.negf %258 : vector<16x128xf32>
    %261 = math.exp %260 : vector<16x128xf32>
    %cst_78 = arith.constant 1.000000e+00 : f32
    %262 = vector.broadcast %cst_78 : f32 to vector<16x128xf32>
    %263 = arith.addf %262, %261 : vector<16x128xf32>
    %264 = arith.divf %262, %263 : vector<16x128xf32>
    %265 = arith.mulf %258, %264 : vector<16x128xf32>
    %266 = arith.mulf %265, %259 : vector<16x128xf32>
    %267 = arith.truncf %266 : vector<16x128xf32> to vector<16x128xbf16>
    %c1_79 = arith.constant 1 : index
    %c0_80 = arith.constant 0 : index
    %c0_81 = arith.constant 0 : index
    %268 = vector.load %arg9[%c1_79, %c0_80, %c0_81] : memref<2x128x64xbf16, #tpu.memory_space<vmem>>, vector<1x128x64xbf16>
    %269 = vector.shape_cast %268 : vector<1x128x64xbf16> to vector<128x64xbf16>
    %cst_82 = arith.constant dense<0.000000e+00> : vector<16x64xf32>
    %270 = tpu.matmul %267, %269, %cst_82 {dimension_numbers = #tpu.dot_dimension_numbers<[1], [0], [0], [1], [0, 0, 1, 1], [], []>} : vector<16x128xbf16>, vector<128x64xbf16>, vector<16x64xf32> -> vector<16x64xf32>
    %271 = arith.addf %239, %270 : vector<16x64xf32>
    %c0_83 = arith.constant 0 : index
    %c0_84 = arith.constant 0 : index
    %272 = vector.load %arg10[%c0_83, %c0_84] : memref<1x64xf32, #tpu.memory_space<vmem>>, vector<1x64xf32>
    %273 = arith.mulf %271, %271 : vector<16x64xf32>
    %cst_85 = arith.constant dense<0.000000e+00> : vector<16xf32>
    %274 = vector.multi_reduction <add>, %273, %cst_85 [1] : vector<16x64xf32> to vector<16xf32>
    %275 = vector.shape_cast %274 : vector<16xf32> to vector<16x1xf32>
    %cst_86 = arith.constant 6.400000e+01 : f32
    %276 = vector.broadcast %cst_86 : f32 to vector<16x1xf32>
    %277 = arith.divf %275, %276 : vector<16x1xf32>
    %cst_87 = arith.constant 9.99999974E-6 : f32
    %278 = vector.broadcast %cst_87 : f32 to vector<16x1xf32>
    %279 = arith.addf %277, %278 : vector<16x1xf32>
    %280 = math.rsqrt %279 : vector<16x1xf32>
    %281 = vector.broadcast %280 : vector<16x1xf32> to vector<16x64xf32>
    %282 = arith.mulf %271, %281 : vector<16x64xf32>
    %283 = vector.broadcast %272 : vector<1x64xf32> to vector<16x64xf32>
    %284 = arith.mulf %282, %283 : vector<16x64xf32>
    %285 = arith.truncf %284 : vector<16x64xf32> to vector<16x64xbf16>
    %c0_88 = arith.constant 0 : index
    %c0_89 = arith.constant 0 : index
    %286 = vector.load %arg11[%c0_88, %c0_89] : memref<64x256xbf16, #tpu.memory_space<vmem>>, vector<64x256xbf16>
    %cst_90 = arith.constant dense<0.000000e+00> : vector<16x256xf32>
    %287 = tpu.matmul %285, %286, %cst_90 {dimension_numbers = #tpu.dot_dimension_numbers<[1], [0], [0], [1], [0, 0, 1, 1], [], []>} : vector<16x64xbf16>, vector<64x256xbf16>, vector<16x256xf32> -> vector<16x256xf32>
    %c0_91 = arith.constant 0 : index
    %c0_92 = arith.constant 0 : index
    %288 = vector.load %arg12[%c0_91, %c0_92] : memref<16x256xf32, #tpu.memory_space<vmem>>, vector<16x256xf32>
    tpu.vector_store %arg12[%c0_91, %c0_92], %287 {strides = array<i32>} : memref<16x256xf32, #tpu.memory_space<vmem>>, vector<16x256xf32>,
    return
  }
}

</mosaic_0001>

<bundles_post_ra>
// kernel: llama_forward.1
= control target key start
LH: loop header
LB: loop body
LE: loop exit
PB: predicated region body
PF: predicated region fallthrough
CT: control target
= control target key end

     0   :  { %vm60_vm0 = vcmask 523264   ;;  %s3616_s0 = inlined_call_operand.vmem [shape: f32[16,64], index: 0, kind: input, shape index: {}]   ;;  %s3617_s1 = inlined_call_operand.vmem [shape: f32[32,16], index: 1, kind: input, shape index: {}]   ;;  %s3618_s2 = inlined_call_operand.vmem [shape: f32[32,16], index: 2, kind: input, shape index: {}]   ;;  %s3619_s3 = inlined_call_operand.vmem [shape: f32[32,16], index: 3, kind: input, shape index: {}]   ;;  %s3620_s4 = inlined_call_operand.vmem [shape: f32[2,1,64], index: 4, kind: input, shape index: {}]   ;;  %s3621_s5 = inlined_call_operand.vmem [shape: bf16[2,64,128], index: 5, kind: input, shape index: {}]   ;;  %s3622_s6 = inlined_call_operand.vmem [shape: bf16[2,64,64], index: 6, kind: input, shape index: {}]   ;;  %s3623_s7 = inlined_call_operand.vmem [shape: f32[2,1,64], index: 7, kind: input, shape index: {}]   ;;  %s3624_s8 = inlined_call_operand.vmem [shape: bf16[2,64,256], index: 8, kind: input, shape index: {}]   ;;  %s3625_s9 = inlined_call_operand.vmem [shape: bf16[2,128,64], index: 9, kind: input, shape index: {}]   ;;  %s3626_s10 = inlined_call_operand.vmem [shape: f32[1,64], index: 10, kind: input, shape index: {}]   ;;  %s3627_s11 = inlined_call_operand.vmem [shape: bf16[64,256], index: 11, kind: input, shape index: {}]   ;;  %s3628_s12 = inlined_call_operand.hbm [shape: f32[16,256], index: 12, kind: output, shape index: {}]  }
   0x1   :  { %v43_v0 = vld [vmem:[%s3616_s0] sm:$0xff]  ;;  %v44_v2 = vld [vmem:[%s3616_s0 + $0x8] sm:$0xff] }
   0x2   :  { %v58_v1 = vmul.f32 %v43_v0, %v43_v0 }
   0x3   :  { %17 = vsyncpa [#allocation3], 0  ;;  %v59_v4 = vmul.f32 %v44_v2, %v44_v2  ;;  %v2617_v6 = vmov 64.0   ;;  %v2370_v10 = vld [vmem:[%s3621_s5 + $0x18] sm:$0xff]  ;;  %v2369_v12 = vld [vmem:[%s3621_s5 + $0x10] sm:$0xff]  ;;  %s2618_s17 = smov 72  }
   0x4   :  { %v61_v3 = vsel %vm60_vm0, %v58_v1, 0.0  ;;  %2475 = vrcp.f32 %v2617_v6  ;;  %145 = vmatpush.bf16.msra.mxu0 %v2370_v10  ;;  %v2368_v14 = vld [vmem:[%s3621_s5 + $0x8] sm:$0xff]  ;;  %v2367_v16 = vld [vmem:[%s3621_s5] sm:$0xff]  ;;  %s2619_s18 = smov 56   ;;  %s2620_s19 = smov 112   ;;  %vm187_vm8 = vcmask 64512  }
   0x5   :  { %62 = vadd.xlane.f32.xlu0 %v61_v3  ;;  %v64_v5 = vsel %vm60_vm0, %v59_v4, 0.0  ;;  %v2470_v37 = vld [vmem:[%s3620_s4] ss:$0 sm:$0xff]  ;;  %s2621_s20 = smov 40   ;;  %s2622_s21 = smov 104   ;;  %v2773_v51 = vld [vmem:[%s3618_s2 + $0x8] sm:$0xff] }
   0x6   :  { %s2623_s22 = smov 88   ;;  %v2758_v45 = vld [vmem:[%s3618_s2] sm:$0xff]  ;;  %s2624_s25 = smov 64   ;;  %v2797_v60 = vld [vmem:[%s3619_s3 + $0x8] sm:$0xff]  ;;  %v2827_v10 = vld [vmem:[%s3618_s2 + $0x18] sm:$0xff]  ;;  %vm247_vm9 = vcmask 130048  }
   0x7   :  { %v2785_v54 = vld [vmem:[%s3619_s3] sm:$0xff]  ;;  %s2625_s30 = smov 80   ;;  %s2626_s15 = smov 32  }
   0x8   :  { %146 = vmatpush.bf16.msra.mxu0 %v2369_v12  ;;  %s3635_s14 = smov 120   ;;  %s3633_s16 = smov 8  }
   0x9   :  { %s3637_s23 = smov 48   ;;  %s3631_s24 = smov 96  }
   0xa   :  { %v2476_v7 = vpop.eup %2475  ;;  %s3629_s29 = smov 16  }
   0xb   :  { %v68_v8 = vmul.f32 64.0, %v2476_v7  ;;  %vm72_vm1 = vweird.f32 %v2476_v7 }
   0xc   :  { %147 = vmatpush.bf16.msra.mxu0 %v2368_v14 }
   0xd   :  { %65 = vadd.xlane.f32.xlu0 %v64_v5  ;;  %v69_v9 = vsub.f32 1.0, %v68_v8 }
   0xf   :  { %v70_v11 = vmul.f32 %v2476_v7, %v69_v9  ;;  %v2819_v9 = vld [vmem:[%s3618_s2 + $0x10] sm:$0xff] }
  0x10   :  { %148 = vmatpush.bf16.msra.mxu0 %v2367_v16 }
  0x11   :  { %v71_v13 = vadd.f32 %v2476_v7, %v70_v11 }
  0x13   :  { %v2716_v15 = vsel %vm72_vm1, %v2476_v7, %v71_v13  ;;  %v2836_v13 = vld [vmem:[%s3619_s3 + $0x10] sm:$0xff] }
  0x78   :  { %v63_v17 = vpop.xlane.xlu0 %62 }
  0x79   :  { %v74_v18 = vmul.f32 %v2716_v15, %v63_v17 }
  0x7b   :  { %v76_v19 = vadd.f32 1e-05, %v74_v18 }
  0x7d   :  { %2477 = vrsqrt.f32 %v76_v19  ;;  %vm84_vm3 = vweird.f32 %v76_v19 }
  0x80   :  { %v66_v20 = vpop.xlane.xlu0 %65 }
  0x81   :  { %v75_v21 = vmul.f32 %v2716_v15, %v66_v20  ;;  %v2844_v20 = vld [vmem:[%s3619_s3 + $0x18] sm:$0xff] }
  0x83   :  { %v2478_v22 = vpop.eup %2477  ;;  %v77_v23 = vadd.f32 1e-05, %v75_v21 }
  0x84   :  { %v79_v24 = vmul.f32 %v2478_v22, %v76_v19  ;;  %vm85_vm2 = vweird.f32 %v2478_v22 }
  0x85   :  { %2479 = vrsqrt.f32 %v77_v23  ;;  %vm86_vm4 = vmor %vm84_vm3, %vm85_vm2  ;;  %vm94_vm6 = vweird.f32 %v77_v23 }
  0x86   :  { %v80_v25 = vmul.f32 %v2478_v22, %v79_v24 }
  0x88   :  { %v81_v26 = vmul.f32 0.5, %v80_v25 }
  0x8a   :  { %v82_v27 = vsub.f32 1.5, %v81_v26 }
  0x8b   :  { %v2480_v28 = vpop.eup %2479 }
  0x8c   :  { %v89_v29 = vmul.f32 %v2480_v28, %v77_v23  ;;  %v83_v30 = vmul.f32 %v2478_v22, %v82_v27  ;;  %vm95_vm5 = vweird.f32 %v2480_v28 }
  0x8d   :  { %vm96_vm7 = vmor %vm94_vm6, %vm95_vm5 }
  0x8e   :  { %v90_v31 = vmul.f32 %v2480_v28, %v89_v29  ;;  %v87_v33 = vsel %vm86_vm4, %v2478_v22, %v83_v30 }
  0x8f   :  { %v98_v36 = vmul.f32 %v87_v33, %v43_v0 }
  0x90   :  { %v91_v32 = vmul.f32 0.5, %v90_v31 }
  0x91   :  { %v103_v40 = vmul.f32 %v2470_v37, %v98_v36 }
  0x92   :  { %v92_v34 = vsub.f32 1.5, %v91_v32 }
  0x94   :  { %v93_v35 = vmul.f32 %v2480_v28, %v92_v34 }
  0x96   :  { %v97_v38 = vsel %vm96_vm7, %v2480_v28, %v93_v35 }
  0x97   :  { %v99_v39 = vmul.f32 %v97_v38, %v44_v2 }
  0x99   :  { %v104_v41 = vmul.f32 %v2470_v37, %v99_v39 }
  0x9b   :  { %v105_v42 = vpack.c.bf16 %v104_v41, %v103_v40 }
  0x9d   :  { %2087 = vmatmul.msk.bf16.vlgmr.msra.gmra.mxu0 %vm60_vm0, %v105_v42 }
 0x11a   :  { %v2727_v43 = vpop.f32.mrf.mxu0 }
 0x11b   :  { %212 = vrot.lane.b32.xlu0 %v2727_v43, %s2618_s17  ;;  %206 = vrot.lane.b32.xlu2 %v2727_v43, %s2619_s18 }
 0x11c   :  { %157 = vrot.lane.b32.xlu1 %v2727_v43, %s2620_s19 }
 0x122   :  { %v2735_v44 = vpop.f32.mrf.mxu0 }
 0x123   :  { %483 = vrot.lane.b32.xlu2 %v2727_v43, %s2621_s20  ;;  %425 = vrot.lane.b32.xlu0 %v2735_v44, %s2622_s21 }
 0x124   :  { %159 = vrot.lane.b32.xlu1 %v2735_v44, %s2620_s19 }
 0x12b   :  { %208 = vrot.lane.b32.xlu2 %v2735_v44, %s2619_s18 }
 0x12c   :  { %214 = vrot.lane.b32.xlu1 %v2735_v44, %s2618_s17 }
 0x133   :  { %411 = vrot.lane.b32.xlu2 %v2727_v43, %s2623_s22 }
 0x134   :  { %485 = vrot.lane.b32.xlu1 %v2735_v44, %s2621_s20 }
 0x13b   :  { %423 = vrot.lane.b32.xlu2 %v2727_v43, %s2622_s21 }
 0x13c   :  { %413 = vrot.lane.b32.xlu1 %v2735_v44, %s2623_s22 }
 0x143   :  { %222 = vrot.lane.b32.xlu2 %v2758_v45, %s2624_s25 }
 0x175   :  { %v207_v46 = vpop.permute.xlu2 %206 }
 0x17d   :  { %v484_v47 = vpop.permute.xlu2 %483 }
 0x17e   :  { %v489_v55 = vsel %vm187_vm8, %v484_v47, %v207_v46 }
 0x17f   :  { %v499_v57 = vmul.f32 %v489_v55, %v2785_v54 }
 0x185   :  { %v209_v49 = vpop.permute.xlu2 %208 }
 0x18d   :  { %v213_v52 = vpop.permute.xlu0 %212  ;;  %v412_v59 = vpop.permute.xlu2 %411 }
 0x18e   :  { %v2762_v48 = vpop.permute.xlu1 %157  ;;  %v218_v53 = vsel %vm187_vm8, %v207_v46, %v213_v52 }
 0x18f   :  { %427 = vrot.lane.b32.xlu0 %v2762_v48, %s2622_s21  ;;  %415 = vrot.lane.b32.xlu1 %v2762_v48, %s2623_s22  ;;  %v230_v56 = vmul.f32 %v218_v53, %v2785_v54 }
 0x195   :  { %v424_v2 = vpop.permute.xlu2 %423  ;;  %v426_v6 = vpop.permute.xlu0 %425 }
 0x196   :  { %v2768_v50 = vpop.permute.xlu1 %159  ;;  %v435_v3 = vsel %vm187_vm8, %v412_v59, %v424_v2 }
 0x197   :  { %224 = vrot.lane.b32.xlu0 %v2773_v51, %s2624_s25  ;;  %429 = vrot.lane.b32.xlu1 %v2768_v50, %s2622_s21  ;;  %v457_v5 = vmul.f32 %v435_v3, %v2785_v54 }
 0x198   :  { %417 = vrot.lane.b32.xlu2 %v2768_v50, %s2623_s22 }
 0x19d   :  { %v2831_v11 = vpop.permute.xlu2 %222 }
 0x19e   :  { %v215_v58 = vpop.permute.xlu1 %214  ;;  %v228_v26 = vmul.f32 %v2831_v11, %v2727_v43 }
 0x19f   :  { %491 = vrot.lane.b32.xlu0 %v2758_v45, %s2625_s30  ;;  %234 = vrot.lane.b32.xlu1 %v230_v56, %s2624_s25  ;;  %v219_v61 = vsel %vm187_vm8, %v209_v49, %v215_v58 }
 0x1a0   :  { %503 = vrot.lane.b32.xlu2 %v499_v57, %s2625_s30  ;;  %v231_v62 = vmul.f32 %v219_v61, %v2797_v60 }
 0x1a6   :  { %v486_v63 = vpop.permute.xlu1 %485 }
 0x1a7   :  { %v490_v0 = vsel %vm187_vm8, %v486_v63, %v209_v49  ;;  %493 = vrot.lane.b32.xlu1 %v2773_v51, %s2625_s30 }
 0x1a8   :  { %v500_v1 = vmul.f32 %v490_v0, %v2797_v60  ;;  %236 = vrot.lane.b32.xlu2 %v231_v62, %s2624_s25 }
 0x1aa   :  { %505 = vrot.lane.b32.xlu0 %v500_v1, %s2625_s30 }
 0x1ae   :  { %v414_v4 = vpop.permute.xlu1 %413 }
 0x1af   :  { %441 = vrot.lane.b32.xlu1 %v2758_v45, %s2626_s15  ;;  %v436_v7 = vsel %vm187_vm8, %v414_v4, %v426_v6 }
 0x1b0   :  { %443 = vrot.lane.b32.xlu2 %v2773_v51, %s2626_s15  ;;  %v458_v8 = vmul.f32 %v436_v7, %v2797_v60 }
 0x1b2   :  { %465 = vrot.lane.b32.xlu0 %v457_v5, %s2626_s15 }
 0x1b7   :  { %467 = vrot.lane.b32.xlu1 %v458_v8, %s2626_s15 }
 0x1b8   :  { %445 = vrot.lane.b32.xlu2 %v2819_v9, %s2626_s15 }
 0x1ba   :  { %447 = vrot.lane.b32.xlu0 %v2827_v10, %s2626_s15 }
 0x1f2   :  { %v418_v12 = vpop.permute.xlu2 %417 }
 0x1fa   :  { %v504_v19 = vpop.permute.xlu2 %503 }
 0x201   :  { %v428_v14 = vpop.permute.xlu0 %427  ;;  %v416_v16 = vpop.permute.xlu1 %415 }
 0x202   :  { %v437_v17 = vsel %vm187_vm8, %v416_v16, %v428_v14  ;;  %v237_v27 = vpop.permute.xlu2 %236 }
 0x203   :  { %v459_v18 = vmul.f32 %v437_v17, %v2836_v13 }
 0x205   :  { %469 = vrot.lane.b32.xlu1 %v459_v18, %s2626_s15  ;;  %v193_v18 = vmul.f32 %v2735_v44, %v2773_v51 }
 0x209   :  { %v430_v21 = vpop.permute.xlu1 %429  ;;  %v2846_v22 = vpop.permute.xlu0 %224 }
 0x20a   :  { %v438_v23 = vsel %vm187_vm8, %v418_v12, %v430_v21  ;;  %v229_v25 = vmul.f32 %v2846_v22, %v2735_v44  ;;  %v2877_v41 = vpop.permute.xlu2 %443 }
 0x20b   :  { %v460_v24 = vmul.f32 %v438_v23, %v2844_v20  ;;  %v454_v47 = vmul.f32 %v2877_v41, %v2735_v44 }
 0x20c   :  { %v241_v29 = vadd.f32 %v237_v27, %v229_v25 }
 0x20d   :  { %163 = vrot.lane.b32.xlu1 %v2727_v43, %s3635_s14  ;;  %471 = vrot.lane.b32.xlu2 %v460_v24, %s2626_s15 }
 0x211   :  { %v235_v28 = vpop.permute.xlu1 %234  ;;  %v2857_v31 = vpop.permute.xlu0 %491 }
 0x212   :  { %v240_v30 = vadd.f32 %v235_v28, %v228_v26  ;;  %v497_v33 = vmul.f32 %v2857_v31, %v2727_v43  ;;  %v2890_v56 = vpop.permute.xlu2 %445 }
 0x213   :  { %v455_v61 = vmul.f32 %v2890_v56, %v2762_v48 }
 0x214   :  { %v242_v32 = vpack.c.bf16 %v241_v29, %v240_v30  ;;  %v509_v37 = vadd.f32 %v504_v19, %v497_v33  ;;  %v192_v19 = vmul.f32 %v2727_v43, %v2758_v45 }
 0x215   :  { %177 = vrot.lane.b32.xlu1 %v2735_v44, %s3633_s16  ;;  %165 = vrot.lane.b32.xlu2 %v2735_v44, %s3635_s14 }
 0x216   :  { %245 = vrot.lane.b32.xlu0 %v242_v32, %s2624_s25  ;;  %v195_v32 = vmul.f32 %v2768_v50, %v2827_v10  ;;  %v46_v10 = vld [vmem:[%s3617_s1 + $0x8] sm:$0xff] }
 0x219   :  { %v2866_v34 = vpop.permute.xlu1 %493 }
 0x21a   :  { %v498_v35 = vmul.f32 %v2866_v34, %v2735_v44 }
 0x21c   :  { %v506_v36 = vpop.permute.xlu0 %505 }
 0x21d   :  { %v510_v38 = vadd.f32 %v506_v36, %v498_v35  ;;  %167 = vrot.lane.b32.xlu1 %v2762_v48, %s3635_s14 }
 0x21e   :  { %175 = vrot.lane.b32.xlu0 %v2727_v43, %s3633_s16 }
 0x21f   :  { %v511_v39 = vpack.c.bf16 %v510_v38, %v509_v37 }
 0x221   :  { %519 = vrot.lane.b32.xlu2 %v511_v39, %s3637_s23  ;;  %v2875_v40 = vpop.permute.xlu1 %441  ;;  %v45_v39 = vld [vmem:[%s3617_s1] sm:$0xff] }
 0x222   :  { %v453_v42 = vmul.f32 %v2875_v40, %v2727_v43 }
 0x224   :  { %v466_v46 = vpop.permute.xlu0 %465 }
 0x225   :  { %181 = vrot.lane.b32.xlu1 %v2768_v50, %s3633_s16  ;;  %v477_v52 = vadd.f32 %v466_v46, %v453_v42 }
 0x229   :  { %169 = vrot.lane.b32.xlu2 %v2768_v50, %s3635_s14  ;;  %v468_v49 = vpop.permute.xlu1 %467 }
 0x22a   :  { %v478_v53 = vadd.f32 %v468_v49, %v454_v47 }
 0x22c   :  { %v481_v55 = vpack.c.bf16 %v478_v53, %v477_v52  ;;  %v2892_v58 = vpop.permute.xlu0 %447 }
 0x22d   :  { %v456_v62 = vmul.f32 %v2892_v58, %v2768_v50 }
 0x22e   :  { %514 = vrot.lane.b32.xlu0 %v481_v55, %s3631_s24 }
 0x236   :  { %179 = vrot.lane.b32.xlu0 %v2762_v48, %s3633_s16 }
 0x267   :  { %v472_v57 = vpop.permute.xlu2 %471 }
 0x268   :  { %v480_v0 = vadd.f32 %v472_v57, %v456_v62  ;;  %v47_v62 = vld [vmem:[%s3617_s1 + $0x10] sm:$0xff] }
 0x26f   :  { %v166_v59 = vpop.permute.xlu2 %165 }
 0x277   :  { %v470_v63 = vpop.permute.xlu1 %469 }
 0x278   :  { %v479_v1 = vadd.f32 %v470_v63, %v455_v61 }
 0x27a   :  { %v482_v2 = vpack.c.bf16 %v480_v0, %v479_v1 }
 0x27b   :  { %v520_v3 = vpop.permute.xlu2 %519 }
 0x27c   :  { %516 = vrot.lane.b32.xlu2 %v482_v2, %s3631_s24  ;;  %v528_v4 = vsel %vm247_vm9, %v520_v3, 0  ;;  %s2059_s24 = sshll.u32 %s3628_s12, 4  ;;  %s2060_s24 = int_to_ptr.hbm [resolvable:$true] %s2059_s24 }
 0x27d   :  { %537 = vmatpush.bf16.xpose.msra.mxu3 %v528_v4 }
 0x27f   :  { %v164_v5 = vpop.permute.xlu1 %163 }
 0x283   :  { %v170_v28 = vpop.permute.xlu2 %169 }
 0x287   :  { %v178_v8 = vpop.permute.xlu1 %177 }
 0x288   :  { %v246_v6 = vpop.permute.xlu0 %245  ;;  %v189_v12 = vsel %vm187_vm8, %v166_v59, %v178_v8 }
 0x289   :  { %v255_v7 = vsel %vm247_vm9, %v246_v6, 0  ;;  %v197_v14 = vmul.f32 %v189_v12, %v2797_v60 }
 0x28a   :  { %264 = vmatpush.bf16.xpose.msra.mxu1 %v255_v7 }
 0x28b   :  { %v201_v23 = vadd.f32 %v197_v14, %v193_v18 }
 0x28f   :  { %v168_v26 = vpop.permute.xlu1 %167 }
 0x290   :  { %v176_v16 = vpop.permute.xlu0 %175 }
 0x291   :  { %v188_v17 = vsel %vm187_vm8, %v164_v5, %v176_v16  ;;  %v48_v5 = vld [vmem:[%s3617_s1 + $0x18] sm:$0xff] }
 0x292   :  { %v196_v21 = vmul.f32 %v188_v17, %v2785_v54  ;;  %v194_v54 = vmul.f32 %v2762_v48, %v2819_v9 }
 0x294   :  { %v200_v24 = vadd.f32 %v196_v21, %v192_v19 }
 0x296   :  { %v204_v25 = vpack.c.bf16 %v201_v23, %v200_v24 }
 0x297   :  { %v182_v60 = vpop.permute.xlu1 %181 }
 0x298   :  { %2088 = vmatmul.msk.bf16.vlgmr.msra.gmra.mxu1 %vm247_vm9, %v204_v25  ;;  %v191_v29 = vsel %vm187_vm8, %v170_v28, %v182_v60 }
 0x299   :  { %v199_v51 = vmul.f32 %v191_v29, %v2844_v20 }
 0x29b   :  { %v203_v35 = vadd.f32 %v199_v51, %v195_v32 }
 0x2a0   :  { %v515_v27 = vpop.permute.xlu0 %514 }
 0x2a1   :  { %2092 = vmatmul.msk.bf16.vlgmr.msra.gmra.mxu3 %vm247_vm9, %v515_v27 }
 0x2a8   :  { %v180_v30 = vpop.permute.xlu0 %179 }
 0x2a9   :  { %v190_v45 = vsel %vm187_vm8, %v168_v26, %v180_v30 }
 0x2aa   :  { %v198_v33 = vmul.f32 %v190_v45, %v2836_v13 }
 0x2ac   :  { %v202_v36 = vadd.f32 %v198_v33, %v194_v54 }
 0x2ae   :  { %v205_v37 = vpack.c.bf16 %v203_v35, %v202_v36 }
 0x2b0   :  { %2089 = vmatmul.msk.bf16.gmra.mxu1 %vm247_vm9, %v205_v37 }
 0x2d6   :  { %v517_v38 = vpop.permute.xlu2 %516 }
 0x2d7   :  { %2093 = vmatmul.msk.bf16.gmra.mxu3 %vm247_vm9, %v517_v38 }
 0x315   :  { %v266_v20 = vpop.f32.mrf.mxu1 }
 0x316   :  { %v276_v42 = vmul.f32 0.25, %v266_v20 }
 0x318   :  { %v280_v48 = vadd.f32 %v276_v42, %v45_v39 }
 0x31a   :  { %v284_v9 = vsel %vm247_vm9, %v280_v48, -inf }
 0x31b   :  { %285 = vmax.xlane.f32.xlu0 %v284_v9 }
 0x31d   :  { %v268_v50 = vpop.f32.mrf.mxu1 }
 0x31e   :  { %v277_v13 = vmul.f32 0.25, %v268_v50 }
 0x320   :  { %v281_v46 = vadd.f32 %v277_v13, %v46_v10 }
 0x322   :  { %v287_v47 = vsel %vm247_vm9, %v281_v46, -inf }
 0x323   :  { %288 = vmax.xlane.f32.xlu1 %v287_v47 }
 0x324   :  { %v539_v49 = vpop.f32.mrf.mxu3 }
 0x325   :  { %v549_v52 = vmul.f32 0.25, %v539_v49 }
 0x327   :  { %v553_v53 = vadd.f32 %v549_v52, %v45_v39 }
 0x329   :  { %v557_v55 = vsel %vm247_vm9, %v553_v53, -inf }
 0x32a   :  { %558 = vmax.xlane.f32.xlu2 %v557_v55  ;;  %v243_v55 = vpack.c.bf16 %v2735_v44, %v2727_v43 }
 0x32c   :  { %v541_v57 = vpop.f32.mrf.mxu3 }
 0x32d   :  { %v550_v59 = vmul.f32 0.25, %v541_v57  ;;  %v271_v61 = vpop.f32.mrf.mxu1 }
 0x32e   :  { %v278_v63 = vmul.f32 0.25, %v271_v61 }
 0x32f   :  { %v554_v0 = vadd.f32 %v550_v59, %v46_v10 }
 0x330   :  { %v282_v1 = vadd.f32 %v278_v63, %v47_v62 }
 0x331   :  { %v560_v2 = vsel %vm247_vm9, %v554_v0, -inf }
 0x332   :  { %561 = vmax.xlane.f32.xlu0 %v560_v2  ;;  %v290_v3 = vsel %vm247_vm9, %v282_v1, -inf }
 0x333   :  { %291 = vmax.xlane.f32.xlu2 %v290_v3 }
 0x335   :  { %v273_v4 = vpop.f32.mrf.mxu1 }
 0x336   :  { %v279_v6 = vmul.f32 0.25, %v273_v4 }
 0x338   :  { %v283_v7 = vadd.f32 %v279_v6, %v48_v5 }
 0x33a   :  { %v293_v8 = vsel %vm247_vm9, %v283_v7, -inf }
 0x33b   :  { %294 = vmax.xlane.f32.xlu1 %v293_v8 }
 0x35a   :  { %v544_v12 = vpop.f32.mrf.mxu3 }
 0x35b   :  { %v551_v14 = vmul.f32 0.25, %v544_v12 }
 0x35d   :  { %v555_v16 = vadd.f32 %v551_v14, %v47_v62 }
 0x35f   :  { %v563_v17 = vsel %vm247_vm9, %v555_v16, -inf }
 0x360   :  { %564 = vmax.xlane.f32.xlu0 %v563_v17 }
 0x362   :  { %v546_v18 = vpop.f32.mrf.mxu3 }
 0x363   :  { %v552_v19 = vmul.f32 0.25, %v546_v18 }
 0x365   :  { %v556_v21 = vadd.f32 %v552_v19, %v48_v5 }
 0x367   :  { %v566_v23 = vsel %vm247_vm9, %v556_v21, -inf }
 0x368   :  { %567 = vmax.xlane.f32.xlu2 %v566_v23 }
 0x38e   :  { %v286_v24 = vpop.xlane.xlu0 %285 }
 0x38f   :  { %v296_v25 = vsub.f32 %v280_v48, %v286_v24 }
 0x391   :  { %v300_v26 = vmul.f32 1.442695, %v296_v25 }
 0x393   :  { %2481 = vpow2.f32 %v300_v26 }
 0x396   :  { %v289_v27 = vpop.xlane.xlu1 %288 }
 0x397   :  { %v297_v60 = vsub.f32 %v281_v46, %v289_v27 }
 0x399   :  { %v2941_v28 = vpop.eup %2481  ;;  %v302_v29 = vmul.f32 1.442695, %v297_v60 }
 0x39a   :  { %v308_v51 = vsel %vm247_vm9, %v2941_v28, 0.0 }
 0x39b   :  { %2483 = vpow2.f32 %v302_v29  ;;  %309 = vadd.xlane.f32.xlu1 %v308_v51 }
 0x39d   :  { %v559_v30 = vpop.xlane.xlu2 %558 }
 0x39e   :  { %v569_v45 = vsub.f32 %v553_v53, %v559_v30 }
 0x3a0   :  { %v573_v54 = vmul.f32 1.442695, %v569_v45 }
 0x3a1   :  { %v2945_v32 = vpop.eup %2483 }
 0x3a2   :  { %2485 = vpow2.f32 %v573_v54  ;;  %v311_v33 = vsel %vm247_vm9, %v2945_v32, 0.0 }
 0x3a3   :  { %312 = vadd.xlane.f32.xlu0 %v311_v33 }
 0x3a5   :  { %v562_v35 = vpop.xlane.xlu0 %561 }
 0x3a6   :  { %v570_v36 = vsub.f32 %v554_v0, %v562_v35  ;;  %v292_v37 = vpop.xlane.xlu2 %291 }
 0x3a7   :  { %v298_v38 = vsub.f32 %v282_v1, %v292_v37 }
 0x3a8   :  { %v2949_v20 = vpop.eup %2485  ;;  %v575_v39 = vmul.f32 1.442695, %v570_v36 }
 0x3a9   :  { %v304_v42 = vmul.f32 1.442695, %v298_v38  ;;  %v581_v48 = vsel %vm247_vm9, %v2949_v20, 0.0 }
 0x3aa   :  { %2487 = vpow2.f32 %v575_v39  ;;  %582 = vadd.xlane.f32.xlu2 %v581_v48 }
 0x3ab   :  { %2489 = vpow2.f32 %v304_v42 }
 0x3ae   :  { %v295_v9 = vpop.xlane.xlu1 %294 }
 0x3af   :  { %v299_v50 = vsub.f32 %v283_v7, %v295_v9 }
 0x3b0   :  { %v2953_v10 = vpop.eup %2487 }
 0x3b1   :  { %v2955_v13 = vpop.eup %2489  ;;  %v306_v46 = vmul.f32 1.442695, %v299_v50  ;;  %v584_v47 = vsel %vm247_vm9, %v2953_v10, 0.0 }
 0x3b2   :  { %585 = vadd.xlane.f32.xlu1 %v584_v47  ;;  %v314_v49 = vsel %vm247_vm9, %v2955_v13, 0.0 }
 0x3b3   :  { %2491 = vpow2.f32 %v306_v46  ;;  %315 = vadd.xlane.f32.xlu0 %v314_v49 }
 0x3b9   :  { %v2961_v52 = vpop.eup %2491 }
 0x3ba   :  { %v317_v53 = vsel %vm247_vm9, %v2961_v52, 0.0 }
 0x3bb   :  { %318 = vadd.xlane.f32.xlu2 %v317_v53 }
 0x3cb   :  { %383 = vrot.lane.b32.xlu1 %v243_v55, %s2626_s15 }
 0x3d3   :  { %v565_v57 = vpop.xlane.xlu0 %564 }
 0x3d4   :  { %v571_v59 = vsub.f32 %v555_v16, %v565_v57 }
 0x3d6   :  { %v577_v61 = vmul.f32 1.442695, %v571_v59 }
 0x3d8   :  { %2493 = vpow2.f32 %v577_v61 }
 0x3db   :  { %v568_v62 = vpop.xlane.xlu2 %567 }
 0x3dc   :  { %v572_v63 = vsub.f32 %v556_v21, %v568_v62 }
 0x3de   :  { %v2968_v0 = vpop.eup %2493  ;;  %v579_v1 = vmul.f32 1.442695, %v572_v63 }
 0x3df   :  { %v587_v2 = vsel %vm247_vm9, %v2968_v0, 0.0 }
 0x3e0   :  { %2495 = vpow2.f32 %v579_v1  ;;  %588 = vadd.xlane.f32.xlu0 %v587_v2 }
 0x3e6   :  { %v2972_v3 = vpop.eup %2495 }
 0x3e7   :  { %v590_v43 = vsel %vm247_vm9, %v2972_v3, 0.0 }
 0x3e8   :  { %591 = vadd.xlane.f32.xlu2 %v590_v43 }
 0x3f4   :  { %655 = vrot.lane.b32.xlu0 %v243_v55, %s3629_s29 }
 0x40e   :  { %v310_v4 = vpop.xlane.xlu1 %309 }
 0x40f   :  { %v331_v60 = vand.u32 2147483648, %v310_v4  ;;  %vm325_vm14 = vweird.f32 %v310_v4  ;;  %v329_v51 = vand.u32 2147483647, %v310_v4 }
 0x411   :  { %v332_v37 = vor.u32 1.1754944e-38, %v331_v60  ;;  %vm330_vm2 = vcmp.eq.f32.partialorder %v329_v51, 8.507059e+37 }
 0x416   :  { %v313_v44 = vpop.xlane.xlu0 %312 }
 0x417   :  { %2497 = vrcp.f32 %v313_v44  ;;  %v346_v24 = vand.u32 2147483648, %v313_v44  ;;  %vm340_vm12 = vweird.f32 %v313_v44  ;;  %v344_v26 = vand.u32 2147483647, %v313_v44 }
 0x418   :  { %2499 = vrcp.f32 %v310_v4 }
 0x419   :  { %v347_v54 = vor.u32 1.1754944e-38, %v346_v24  ;;  %vm345_vm1 = vcmp.eq.f32.partialorder %v344_v26, 8.507059e+37 }
 0x41d   :  { %v2498_v5 = vpop.eup %2497  ;;  %v2977_v8 = vpop.xlane.xlu2 %582 }
 0x41e   :  { %v2500_v6 = vpop.eup %2499  ;;  %v336_v7 = vmul.f32 %v2498_v5, %v313_v44  ;;  %vm341_vm10 = vweird.f32 %v2498_v5  ;;  %v604_v60 = vand.u32 2147483648, %v2977_v8 }
 0x41f   :  { %v321_v12 = vmul.f32 %v2500_v6, %v310_v4  ;;  %vm326_vm11 = vweird.f32 %v2500_v6  ;;  %vm342_vm13 = vmor %vm340_vm12, %vm341_vm10 }
 0x420   :  { %v337_v14 = vsub.f32 1.0, %v336_v7  ;;  %vm327_vm15 = vmor %vm325_vm14, %vm326_vm11 }
 0x421   :  { %v322_v16 = vsub.f32 1.0, %v321_v12 }
 0x422   :  { %v338_v18 = vmul.f32 %v2498_v5, %v337_v14 }
 0x423   :  { %v323_v21 = vmul.f32 %v2500_v6, %v322_v16 }
 0x424   :  { %v339_v23 = vadd.f32 %v2498_v5, %v338_v18 }
 0x425   :  { %v324_v25 = vadd.f32 %v2500_v6, %v323_v21  ;;  %v2979_v30 = vpop.xlane.xlu1 %585 }
 0x426   :  { %v316_v17 = vpop.xlane.xlu0 %315  ;;  %v343_v45 = vsel %vm342_vm13, %v2498_v5, %v339_v23  ;;  %v617_v26 = vand.u32 2147483647, %v2979_v30 }
 0x427   :  { %2501 = vrcp.f32 %v316_v17  ;;  %v328_v36 = vsel %vm327_vm15, %v2500_v6, %v324_v25  ;;  %v348_v38 = vsel %vm345_vm1, %v347_v54, %v343_v45  ;;  %v361_v62 = vand.u32 2147483648, %v316_v17 }
 0x428   :  { %v333_v42 = vsel %vm330_vm2, %v332_v37, %v328_v36  ;;  %v349_v9 = vmul.f32 %v2945_v32, %v348_v38  ;;  %vm355_vm7 = vweird.f32 %v316_v17  ;;  %v359_v32 = vand.u32 2147483647, %v316_v17 }
 0x429   :  { %v334_v47 = vmul.f32 %v2941_v28, %v333_v42  ;;  %v362_v2 = vor.u32 1.1754944e-38, %v361_v62  ;;  %vm613_vm15 = vweird.f32 %v2979_v30  ;;  %vm598_vm2 = vweird.f32 %v2977_v8 }
 0x42a   :  { %vm360_vm12 = vcmp.eq.f32.partialorder %v359_v32, 8.507059e+37 }
 0x42b   :  { %v380_v53 = vpack.c.bf16 %v349_v9, %v334_v47 }
 0x42d   :  { %v2502_v27 = vpop.eup %2501 }
 0x42e   :  { %v319_v19 = vpop.xlane.xlu2 %318  ;;  %v351_v35 = vmul.f32 %v2502_v27, %v316_v17  ;;  %vm356_vm4 = vweird.f32 %v2502_v27 }
 0x42f   :  { %2503 = vrcp.f32 %v319_v19  ;;  %v376_v57 = vand.u32 2147483648, %v319_v19  ;;  %vm370_vm5 = vweird.f32 %v319_v19  ;;  %v374_v61 = vand.u32 2147483647, %v319_v19  ;;  %vm357_vm10 = vmor %vm355_vm7, %vm356_vm4 }
 0x430   :  { %v352_v48 = vsub.f32 1.0, %v351_v35  ;;  %2505 = vrcp.f32 %v2979_v30  ;;  %vm618_vm4 = vcmp.eq.f32.partialorder %v617_v26, 8.507059e+37  ;;  %v605_v35 = vor.u32 1.1754944e-38, %v604_v60 }
 0x431   :  { %v377_v28 = vor.u32 1.1754944e-38, %v376_v57  ;;  %2507 = vrcp.f32 %v2977_v8  ;;  %vm375_vm11 = vcmp.eq.f32.partialorder %v374_v61, 8.507059e+37 }
 0x432   :  { %v353_v49 = vmul.f32 %v2502_v27, %v352_v48 }
 0x434   :  { %v354_v59 = vadd.f32 %v2502_v27, %v353_v49 }
 0x435   :  { %v2504_v29 = vpop.eup %2503 }
 0x436   :  { %v366_v33 = vmul.f32 %v2504_v29, %v319_v19  ;;  %vm371_vm3 = vweird.f32 %v2504_v29  ;;  %v358_v1 = vsel %vm357_vm10, %v2502_v27, %v354_v59  ;;  %v2506_v4 = vpop.eup %2505 }
 0x437   :  { %vm372_vm6 = vmor %vm370_vm5, %vm371_vm3  ;;  %v363_v44 = vsel %vm360_vm12, %v362_v2, %v358_v1  ;;  %v2508_v6 = vpop.eup %2507  ;;  %v609_v12 = vmul.f32 %v2506_v4, %v2979_v30  ;;  %vm614_vm13 = vweird.f32 %v2506_v4 }
 0x438   :  { %v367_v39 = vsub.f32 1.0, %v366_v33  ;;  %v364_v7 = vmul.f32 %v2955_v13, %v363_v44  ;;  %v594_v16 = vmul.f32 %v2508_v6, %v2977_v8  ;;  %vm599_vm14 = vweird.f32 %v2508_v6  ;;  %vm615_vm1 = vmor %vm613_vm15, %vm614_vm13 }
 0x439   :  { %v610_v17 = vsub.f32 1.0, %v609_v12  ;;  %vm600_vm3 = vmor %vm598_vm2, %vm599_vm14  ;;  %vm712_vm2 = vcmask 392192  }
 0x43a   :  { %v368_v50 = vmul.f32 %v2504_v29, %v367_v39  ;;  %v595_v18 = vsub.f32 1.0, %v594_v16 }
 0x43b   :  { %v611_v21 = vmul.f32 %v2506_v4, %v610_v17 }
 0x43c   :  { %v369_v55 = vadd.f32 %v2504_v29, %v368_v50  ;;  %v596_v23 = vmul.f32 %v2508_v6, %v595_v18 }
 0x43d   :  { %v384_v46 = vpop.permute.xlu1 %383  ;;  %v612_v24 = vadd.f32 %v2506_v4, %v611_v21  ;;  %v2372_v21 = vld [vmem:[%s3622_s6 + $0x8] sm:$0xff] }
 0x43e   :  { %399 = vmatpush.bf16.msra.mxu2 %v384_v46  ;;  %v373_v63 = vsel %vm372_vm6, %v2504_v29, %v369_v55  ;;  %v597_v13 = vadd.f32 %v2508_v6, %v596_v23  ;;  %v602_v29 = vand.u32 2147483647, %v2977_v8  ;;  %v2371_v23 = vld [vmem:[%s3622_s6] sm:$0xff] }
 0x43f   :  { %v378_v43 = vsel %vm375_vm11, %v377_v28, %v373_v63  ;;  %v616_v51 = vsel %vm615_vm1, %v2506_v4, %v612_v24  ;;  %vm709_vm1 = vcmask 261120  }
 0x440   :  { %v379_v5 = vmul.f32 %v2961_v52, %v378_v43  ;;  %v619_v52 = vand.u32 2147483648, %v2979_v30  ;;  %v601_v54 = vsel %vm600_vm3, %v2508_v6, %v597_v13  ;;  %vm603_vm5 = vcmp.eq.f32.partialorder %v602_v29, 8.507059e+37 }
 0x441   :  { %2090 = vmatmul.msk.bf16.vlgmr.msra.gmra.mxu2 %vm247_vm9, %v380_v53  ;;  %v606_v38 = vsel %vm603_vm5, %v605_v35, %v601_v54 }
 0x442   :  { %v381_v14 = vpack.c.bf16 %v379_v5, %v364_v7  ;;  %v620_v45 = vor.u32 1.1754944e-38, %v619_v52  ;;  %v607_v50 = vmul.f32 %v2949_v20, %v606_v38 }
 0x444   :  { %v621_v36 = vsel %vm618_vm4, %v620_v45, %v616_v51 }
 0x445   :  { %v622_v42 = vmul.f32 %v2953_v10, %v621_v36 }
 0x447   :  { %v653_v47 = vpack.c.bf16 %v622_v42, %v607_v50 }
 0x451   :  { %2091 = vmatmul.msk.bf16.gmra.mxu2 %vm247_vm9, %v381_v14 }
 0x453   :  { %v589_v19 = vpop.xlane.xlu0 %588 }
 0x454   :  { %2509 = vrcp.f32 %v589_v19  ;;  %v634_v59 = vand.u32 2147483648, %v589_v19  ;;  %vm628_vm12 = vweird.f32 %v589_v19  ;;  %v632_v10 = vand.u32 2147483647, %v589_v19 }
 0x456   :  { %v635_v32 = vor.u32 1.1754944e-38, %v634_v59  ;;  %vm633_vm15 = vcmp.eq.f32.partialorder %v632_v10, 8.507059e+37  ;;  %v2141_v10 = vld [vmem:[%s3624_s8 + $0x38] sm:$0xf0] }
 0x45a   :  { %v2510_v27 = vpop.eup %2509 }
 0x45b   :  { %v592_v25 = vpop.xlane.xlu2 %591  ;;  %v624_v33 = vmul.f32 %v2510_v27, %v589_v19  ;;  %vm629_vm7 = vweird.f32 %v2510_v27  ;;  %v2373_v19 = vld [vmem:[%s3622_s6 + $0x10] sm:$0xff] }
 0x45c   :  { %2511 = vrcp.f32 %v592_v25  ;;  %v649_v53 = vand.u32 2147483648, %v592_v25  ;;  %vm643_vm10 = vweird.f32 %v592_v25  ;;  %v647_v57 = vand.u32 2147483647, %v592_v25  ;;  %vm630_vm13 = vmor %vm628_vm12, %vm629_vm7 }
 0x45d   :  { %v625_v39 = vsub.f32 1.0, %v624_v33 }
 0x45e   :  { %v650_v20 = vor.u32 1.1754944e-38, %v649_v53  ;;  %vm648_vm14 = vcmp.eq.f32.partialorder %v647_v57, 8.507059e+37  ;;  %v2139_v53 = vld [vmem:[%s3624_s8 + $0x30] sm:$0xf]  ;;  %v2381_v57 = vld [vmem:[%s3624_s8 + $0x34] sm:$0xf] }
 0x45f   :  { %v626_v46 = vmul.f32 %v2510_v27, %v625_v39  ;;  %v2577_v39 = vld [vmem:[%s3616_s0] sm:$0xff] }
 0x461   :  { %v627_v55 = vadd.f32 %v2510_v27, %v626_v46 }
 0x462   :  { %v2512_v37 = vpop.eup %2511 }
 0x463   :  { %v639_v30 = vmul.f32 %v2512_v37, %v592_v25  ;;  %vm644_vm6 = vweird.f32 %v2512_v37  ;;  %v631_v62 = vsel %vm630_vm13, %v2510_v27, %v627_v55  ;;  %v2382_v55 = vld [vmem:[%s3624_s8 + $0x34] sm:$0xf0] }
 0x464   :  { %vm645_vm11 = vmor %vm643_vm10, %vm644_vm6  ;;  %v636_v28 = vsel %vm633_vm15, %v635_v32, %v631_v62  ;;  %v2140_v59 = vor.u32 %v2382_v55, %v2139_v53  ;;  %v2380_v62 = vld [vmem:[%s3624_s8 + $0x24] sm:$0xf0]  ;;  %v2379_v32 = vld [vmem:[%s3624_s8 + $0x24] sm:$0xf] }
 0x465   :  { %v640_v48 = vsub.f32 1.0, %v639_v30  ;;  %v637_v2 = vmul.f32 %v2968_v0, %v636_v28  ;;  %v2374_v0 = vld [vmem:[%s3622_s6 + $0x18] sm:$0xff]  ;;  %v2133_v28 = vld [vmem:[%s3624_s8 + $0x28] sm:$0xf0]  ;;  %v2387_v53 = vld [vmem:[%s3625_s9 + $0x20] sm:$0xff] }
 0x466   :  { %v656_v9 = vpop.permute.xlu0 %655  ;;  %755 = vmatpush.bf16.msrb.mxu2 %v2374_v0  ;;  %863 = vmatpush.bf16.msrb.mxu1 %v2140_v59  ;;  %v2386_v55 = vld [vmem:[%s3625_s9 + $0x18] sm:$0xff]  ;;  %v2385_v59 = vld [vmem:[%s3625_s9 + $0x10] sm:$0xff] }
 0x467   :  { %v641_v8 = vmul.f32 %v2512_v37, %v640_v48  ;;  %671 = vmatpush.bf16.msrb.mxu0 %v656_v9 }
 0x469   :  { %v642_v49 = vadd.f32 %v2512_v37, %v641_v8  ;;  %v2578_v8 = vld [vmem:[%s3616_s0 + $0x8] sm:$0xff] }
 0x46a   :  { %2094 = vmatmul.msk.bf16.vlgmr.msrb.gmra.mxu0 %vm247_vm9, %v653_v47  ;;  %756 = vmatpush.bf16.msrb.mxu2 %v2373_v19 }
 0x46b   :  { %v646_v61 = vsel %vm645_vm11, %v2512_v37, %v642_v49 }
 0x46c   :  { %v651_v63 = vsel %vm648_vm14, %v650_v20, %v646_v61  ;;  %v2144_v61 = vor.u32 %v2381_v57, %v2141_v10  ;;  %v2131_v20 = vld [vmem:[%s3624_s8 + $0x20] sm:$0xf] }
 0x46d   :  { %v652_v1 = vmul.f32 %v2972_v3, %v651_v63  ;;  %v2132_v63 = vor.u32 %v2380_v62, %v2131_v20  ;;  %v2383_v62 = vld [vmem:[%s3625_s9] sm:$0xff] }
 0x46e   :  { %757 = vmatpush.bf16.msrb.mxu2 %v2372_v21  ;;  %877 = vmatpush.bf16.msrb.mxu3 %v2144_v61  ;;  %v2384_v61 = vld [vmem:[%s3625_s9 + $0x8] sm:$0xff] }
 0x46f   :  { %v654_v43 = vpack.c.bf16 %v652_v1, %v637_v2  ;;  %v2136_v1 = vor.u32 %v2379_v32, %v2133_v28  ;;  %864 = vmatpush.bf16.msrb.mxu1 %v2132_v63  ;;  %v2123_v2 = vld [vmem:[%s3624_s8 + $0x10] sm:$0xf] }
 0x472   :  { %758 = vmatpush.bf16.msrb.mxu2 %v2371_v23  ;;  %878 = vmatpush.bf16.msrb.mxu3 %v2136_v1 }
 0x47a   :  { %2095 = vmatmul.msk.bf16.gmra.mxu0 %vm247_vm9, %v654_v43  ;;  %v2378_v43 = vld [vmem:[%s3624_s8 + $0x14] sm:$0xf0] }
 0x4c4   :  { %v401_v44 = vpop.f32.mrf.mxu2 }
 0x4cc   :  { %v403_v4 = vpop.f32.mrf.mxu2 }
 0x4d4   :  { %v406_v5 = vpop.f32.mrf.mxu2 }
 0x4dc   :  { %v408_v6 = vpop.f32.mrf.mxu2 }
 0x4dd   :  { %v2440_v7 = vpack.i.bf16 %v408_v6, %v406_v5  ;;  %v2125_v5 = vld [vmem:[%s3624_s8 + $0x18] sm:$0xf0] }
 0x4df   :  { %2441 = vrot.lane.b32.xlu2 %v2440_v7, %s3629_s29  ;;  %v2115_v7 = vld [vmem:[%s3624_s8] sm:$0xf] }
 0x4e7   :  { %v673_v12 = vpop.f32.mrf.mxu0 }
 0x4ef   :  { %v675_v14 = vpop.f32.mrf.mxu0 }
 0x4f0   :  { %v2445_v16 = vpack.i.bf16 %v675_v14, %v673_v12  ;;  %v2376_v12 = vld [vmem:[%s3624_s8 + $0x4] sm:$0xf0]  ;;  %v2375_v14 = vld [vmem:[%s3624_s8 + $0x4] sm:$0xf] }
 0x4f2   :  { %2446 = vrot.lane.b32.xlu1 %v2445_v16, %s2626_s15 }
 0x4f7   :  { %v678_v17 = vpop.f32.mrf.mxu0 }
 0x4ff   :  { %v680_v18 = vpop.f32.mrf.mxu0 }
 0x500   :  { %v2450_v3 = vpack.i.bf16 %v680_v18, %v678_v17  ;;  %v2116_v17 = vor.u32 %v2376_v12, %v2115_v7  ;;  %v2117_v18 = vld [vmem:[%s3624_s8 + $0x8] sm:$0xf0] }
 0x501   :  { %v2120_v0 = vor.u32 %v2375_v14, %v2117_v18 }
 0x502   :  { %2451 = vrot.lane.b32.xlu0 %v2450_v3, %s3637_s23  ;;  %s2633_s23 = smov 256  }
 0x539   :  { %v2442_v24 = vpop.permute.xlu2 %2441 }
 0x53a   :  { %v2444_v25 = vunpack.i.h.bf16 %v2442_v24  ;;  %v2443_v13 = vunpack.i.l.bf16 %v2442_v24 }
 0x53c   :  { %v708_v29 = vsel %vm247_vm9, %v403_v4, %v2444_v25  ;;  %v707_v51 = vsel %vm247_vm9, %v401_v44, %v2443_v13  ;;  %v2377_v44 = vld [vmem:[%s3624_s8 + $0x14] sm:$0xf]  ;;  %v2124_v4 = vor.u32 %v2378_v43, %v2123_v2 }
 0x53d   :  { %v2128_v6 = vor.u32 %v2377_v44, %v2125_v5 }
 0x53e   :  { %865 = vmatpush.bf16.msrb.mxu1 %v2124_v4 }
 0x53f   :  { %879 = vmatpush.bf16.msrb.mxu3 %v2128_v6 }
 0x542   :  { %866 = vmatpush.bf16.msrb.mxu1 %v2116_v17 }
 0x543   :  { %880 = vmatpush.bf16.msrb.mxu3 %v2120_v0 }
 0x564   :  { %v2447_v52 = vpop.permute.xlu1 %2446 }
 0x565   :  { %v2449_v26 = vunpack.i.h.bf16 %v2447_v52  ;;  %v2448_v27 = vunpack.i.l.bf16 %v2447_v52 }
 0x567   :  { %v711_v33 = vsel %vm709_vm1, %v708_v29, %v2449_v26  ;;  %v710_v35 = vsel %vm709_vm1, %v707_v51, %v2448_v27 }
 0x574   :  { %v2452_v60 = vpop.permute.xlu0 %2451 }
 0x575   :  { %v2454_v45 = vunpack.i.h.bf16 %v2452_v60  ;;  %v2453_v54 = vunpack.i.l.bf16 %v2452_v60 }
 0x577   :  { %v713_v36 = vsel %vm712_vm2, %v710_v35, %v2453_v54  ;;  %v714_v37 = vsel %vm712_vm2, %v711_v33, %v2454_v45 }
 0x578   :  { %v715_v30 = vpack.c.bf16 %v714_v37, %v713_v36 }
 0x57a   :  { %2112 = vmatmul.msk.bf16.vlgmr.msrb.gmra.mxu2 %vm60_vm0, %v715_v30  ;;  %v2471_v30 = vld [vmem:[%s3623_s7] ss:$0 sm:$0xff] }
 0x5fd   :  { %v760_v38 = vpop.f32.mrf.mxu2 }
 0x5fe   :  { %v3028_v42 = vadd.f32 %v2577_v39, %v760_v38 }
 0x600   :  { %v768_v48 = vmul.f32 %v3028_v42, %v3028_v42 }
 0x602   :  { %v770_v9 = vsel %vm60_vm0, %v768_v48, 0.0 }
 0x603   :  { %771 = vadd.xlane.f32.xlu1 %v770_v9 }
 0x605   :  { %v762_v50 = vpop.f32.mrf.mxu2 }
 0x606   :  { %v3036_v46 = vadd.f32 %v2578_v8, %v762_v50  ;;  %v2390_v8 = vld [vmem:[%s3625_s9 + $0x38] sm:$0xff] }
 0x607   :  { %994 = vmatpush.bf16.msra.mxu0 %v2390_v8 }
 0x608   :  { %v769_v47 = vmul.f32 %v3036_v46, %v3036_v46 }
 0x60a   :  { %v773_v49 = vsel %vm60_vm0, %v769_v47, 0.0  ;;  %v2389_v47 = vld [vmem:[%s3625_s9 + $0x30] sm:$0xff] }
 0x60b   :  { %774 = vadd.xlane.f32.xlu2 %v773_v49  ;;  %995 = vmatpush.bf16.msra.mxu0 %v2389_v47  ;;  %v2388_v49 = vld [vmem:[%s3625_s9 + $0x28] sm:$0xff]  ;;  %v2391_v47 = vld [vmem:[%s3621_s5 + $0x20] sm:$0xff] }
 0x60f   :  { %996 = vmatpush.bf16.msra.mxu0 %v2388_v49 }
 0x613   :  { %997 = vmatpush.bf16.msra.mxu0 %v2387_v53 }
 0x617   :  { %998 = vmatpush.bf16.msra.mxu0 %v2386_v55 }
 0x61b   :  { %999 = vmatpush.bf16.msra.mxu0 %v2385_v59 }
 0x61f   :  { %1000 = vmatpush.bf16.msra.mxu0 %v2384_v61 }
 0x623   :  { %1001 = vmatpush.bf16.msra.mxu0 %v2383_v62 }
 0x676   :  { %v772_v16 = vpop.xlane.xlu1 %771 }
 0x677   :  { %v776_v3 = vmul.f32 %v772_v16, %v2716_v15 }
 0x679   :  { %v778_v19 = vadd.f32 1e-05, %v776_v3 }
 0x67b   :  { %2513 = vrsqrt.f32 %v778_v19  ;;  %vm786_vm4 = vweird.f32 %v778_v19 }
 0x67e   :  { %v775_v21 = vpop.xlane.xlu2 %774 }
 0x67f   :  { %v777_v23 = vmul.f32 %v775_v21, %v2716_v15 }
 0x681   :  { %v2514_v24 = vpop.eup %2513  ;;  %v779_v52 = vadd.f32 1e-05, %v777_v23 }
 0x682   :  { %v781_v25 = vmul.f32 %v2514_v24, %v778_v19  ;;  %vm787_vm3 = vweird.f32 %v2514_v24 }
 0x683   :  { %2515 = vrsqrt.f32 %v779_v52  ;;  %vm788_vm5 = vmor %vm786_vm4, %vm787_vm3  ;;  %vm796_vm7 = vweird.f32 %v779_v52 }
 0x684   :  { %v782_v13 = vmul.f32 %v2514_v24, %v781_v25 }
 0x686   :  { %v783_v26 = vmul.f32 0.5, %v782_v13 }
 0x688   :  { %v784_v27 = vsub.f32 1.5, %v783_v26 }
 0x689   :  { %v2516_v60 = vpop.eup %2515 }
 0x68a   :  { %v791_v29 = vmul.f32 %v2516_v60, %v779_v52  ;;  %v785_v51 = vmul.f32 %v2514_v24, %v784_v27  ;;  %vm797_vm6 = vweird.f32 %v2516_v60 }
 0x68b   :  { %vm798_vm10 = vmor %vm796_vm7, %vm797_vm6 }
 0x68c   :  { %v792_v45 = vmul.f32 %v2516_v60, %v791_v29  ;;  %v789_v33 = vsel %vm788_vm5, %v2514_v24, %v785_v51 }
 0x68d   :  { %v800_v37 = vmul.f32 %v789_v33, %v3028_v42 }
 0x68e   :  { %v793_v54 = vmul.f32 0.5, %v792_v45 }
 0x68f   :  { %v805_v48 = vmul.f32 %v2471_v30, %v800_v37 }
 0x690   :  { %v794_v35 = vsub.f32 1.5, %v793_v54 }
 0x692   :  { %v795_v36 = vmul.f32 %v2516_v60, %v794_v35 }
 0x694   :  { %v799_v38 = vsel %vm798_vm10, %v2516_v60, %v795_v36 }
 0x695   :  { %v801_v39 = vmul.f32 %v799_v38, %v3036_v46 }
 0x697   :  { %v806_v9 = vmul.f32 %v2471_v30, %v801_v39 }
 0x699   :  { %v807_v50 = vpack.c.bf16 %v806_v9, %v805_v48  ;;  %v2393_v9 = vld [vmem:[%s3621_s5 + $0x30] sm:$0xff] }
 0x69b   :  { %2145 = vmatmul.msk.bf16.vlgmr.msrb.gmra.mxu1 %vm60_vm0, %v807_v50  ;;  %2146 = vmatmul.msk.bf16.vlgmr.msrb.gmra.mxu3 %vm60_vm0, %v807_v50 }
 0x718   :  { %v868_v57 = vpop.f32.mrf.mxu1 }
 0x719   :  { %v2147_v10 = vmul.f32 -1.442695, %v868_v57 }
 0x71b   :  { %2517 = vpow2.f32 %v2147_v10 }
 0x71e   :  { %v882_v17 = vpop.f32.mrf.mxu3 }
 0x720   :  { %v870_v20 = vpop.f32.mrf.mxu1 }
 0x721   :  { %v2518_v32 = vpop.eup %2517  ;;  %v2148_v63 = vmul.f32 -1.442695, %v870_v20 }
 0x722   :  { %v893_v28 = vadd.f32 1.0, %v2518_v32 }
 0x723   :  { %2519 = vpow2.f32 %v2148_v63 }
 0x724   :  { %2521 = vrcp.f32 %v893_v28  ;;  %v906_v12 = vand.u32 2147483648, %v893_v28  ;;  %vm900_vm12 = vweird.f32 %v893_v28  ;;  %v904_v14 = vand.u32 2147483647, %v893_v28 }
 0x726   :  { %v907_v0 = vor.u32 1.1754944e-38, %v906_v12  ;;  %vm905_vm14 = vcmp.eq.f32.partialorder %v904_v14, 8.507059e+37  ;;  %v884_v29 = vpop.f32.mrf.mxu3 }
 0x729   :  { %v2520_v1 = vpop.eup %2519 }
 0x72a   :  { %v2522_v2 = vpop.eup %2521  ;;  %v894_v43 = vadd.f32 1.0, %v2520_v1 }
 0x72b   :  { %v896_v44 = vmul.f32 %v2522_v2, %v893_v28  ;;  %vm901_vm11 = vweird.f32 %v2522_v2 }
 0x72c   :  { %2523 = vrcp.f32 %v894_v43  ;;  %vm902_vm13 = vmor %vm900_vm12, %vm901_vm11  ;;  %v921_v19 = vand.u32 2147483648, %v894_v43  ;;  %v919_v23 = vand.u32 2147483647, %v894_v43  ;;  %vm915_vm3 = vweird.f32 %v894_v43 }
 0x72d   :  { %v897_v4 = vsub.f32 1.0, %v896_v44 }
 0x72e   :  { %v922_v25 = vor.u32 1.1754944e-38, %v921_v19  ;;  %vm920_vm5 = vcmp.eq.f32.partialorder %v919_v23, 8.507059e+37 }
 0x72f   :  { %v898_v5 = vmul.f32 %v2522_v2, %v897_v4 }
 0x731   :  { %v899_v6 = vadd.f32 %v2522_v2, %v898_v5  ;;  %v2472_v5 = vld [vmem:[%s3620_s4 + $0x1] ss:$0 sm:$0xff] }
 0x732   :  { %v2524_v7 = vpop.eup %2523 }
 0x733   :  { %v911_v16 = vmul.f32 %v2524_v7, %v894_v43  ;;  %v903_v18 = vsel %vm902_vm13, %v2522_v2, %v899_v6  ;;  %vm916_vm15 = vweird.f32 %v2524_v7 }
 0x734   :  { %v908_v24 = vsel %vm905_vm14, %v907_v0, %v903_v18  ;;  %vm917_vm4 = vmor %vm915_vm3, %vm916_vm15 }
 0x735   :  { %v912_v3 = vsub.f32 1.0, %v911_v16  ;;  %v925_v13 = vmul.f32 %v908_v24, %v868_v57 }
 0x737   :  { %v913_v21 = vmul.f32 %v2524_v7, %v912_v3  ;;  %v927_v51 = vmul.f32 %v925_v13, %v882_v17  ;;  %v3198_v13 = vld [vmem:[%s3619_s3] sm:$0xff] }
 0x739   :  { %v914_v52 = vadd.f32 %v2524_v7, %v913_v21 }
 0x73b   :  { %v918_v26 = vsel %vm917_vm4, %v2524_v7, %v914_v52 }
 0x73c   :  { %v923_v27 = vsel %vm920_vm5, %v922_v25, %v918_v26 }
 0x73d   :  { %v926_v60 = vmul.f32 %v923_v27, %v870_v20 }
 0x73f   :  { %v928_v45 = vmul.f32 %v926_v60, %v884_v29  ;;  %v3206_v29 = vld [vmem:[%s3619_s3 + $0x8] sm:$0xff] }
 0x741   :  { %v929_v54 = vpack.c.bf16 %v928_v45, %v927_v51 }
 0x743   :  { %1002 = vmatmul.bf16.vlgmr.msra.gmra.mxu0 %v929_v54 }
 0x7c0   :  { %v1003_v33 = vpop.f32.mrf.mxu0 }
 0x7c1   :  { %v3123_v35 = vadd.f32 %v1003_v33, %v3028_v42  ;;  %v2394_v42 = vld [vmem:[%s3621_s5 + $0x38] sm:$0xff] }
 0x7c2   :  { %1092 = vmatpush.bf16.msra.mxu2 %v2394_v42 }
 0x7c3   :  { %v1012_v36 = vmul.f32 %v3123_v35, %v3123_v35 }
 0x7c5   :  { %v1014_v37 = vsel %vm60_vm0, %v1012_v36, 0.0 }
 0x7c6   :  { %1015 = vadd.xlane.f32.xlu0 %v1014_v37  ;;  %1093 = vmatpush.bf16.msra.mxu2 %v2393_v9 }
 0x7c8   :  { %v1005_v30 = vpop.f32.mrf.mxu0 }
 0x7c9   :  { %v3129_v38 = vadd.f32 %v1005_v30, %v3036_v46  ;;  %v2392_v46 = vld [vmem:[%s3621_s5 + $0x28] sm:$0xff]  ;;  %s2632_s5 = smov [#allocation2]  }
 0x7ca   :  { %1094 = vmatpush.bf16.msra.mxu2 %v2392_v46 }
 0x7cb   :  { %v1013_v39 = vmul.f32 %v3129_v38, %v3129_v38 }
 0x7cd   :  { %v1017_v48 = vsel %vm60_vm0, %v1013_v39, 0.0 }
 0x7ce   :  { %1018 = vadd.xlane.f32.xlu1 %v1017_v48  ;;  %1095 = vmatpush.bf16.msra.mxu2 %v2391_v47 }
 0x839   :  { %v1016_v50 = vpop.xlane.xlu0 %1015 }
 0x83a   :  { %v1020_v8 = vmul.f32 %v1016_v50, %v2716_v15 }
 0x83c   :  { %v1022_v49 = vadd.f32 1e-05, %v1020_v8 }
 0x83e   :  { %2525 = vrsqrt.f32 %v1022_v49  ;;  %vm1030_vm7 = vweird.f32 %v1022_v49 }
 0x841   :  { %v1019_v53 = vpop.xlane.xlu1 %1018 }
 0x842   :  { %v1021_v55 = vmul.f32 %v1019_v53, %v2716_v15 }
 0x844   :  { %v2526_v57 = vpop.eup %2525  ;;  %v1023_v59 = vadd.f32 1e-05, %v1021_v55  ;;  %v3226_v55 = vld [vmem:[%s3619_s3 + $0x10] sm:$0xff] }
 0x845   :  { %v1025_v10 = vmul.f32 %v2526_v57, %v1022_v49  ;;  %vm1031_vm6 = vweird.f32 %v2526_v57 }
 0x846   :  { %2527 = vrsqrt.f32 %v1023_v59  ;;  %vm1032_vm10 = vmor %vm1030_vm7, %vm1031_vm6  ;;  %vm1040_vm12 = vweird.f32 %v1023_v59 }
 0x847   :  { %v1026_v61 = vmul.f32 %v2526_v57, %v1025_v10 }
 0x849   :  { %v1027_v20 = vmul.f32 0.5, %v1026_v61 }
 0x84b   :  { %v1028_v62 = vsub.f32 1.5, %v1027_v20  ;;  %v3240_v20 = vld [vmem:[%s3619_s3 + $0x18] sm:$0xff]  ;;  %s3641_s3 = smov 48  }
 0x84c   :  { %v2528_v32 = vpop.eup %2527 }
 0x84d   :  { %v1035_v63 = vmul.f32 %v2528_v32, %v1023_v59  ;;  %v1029_v28 = vmul.f32 %v2526_v57, %v1028_v62  ;;  %vm1041_vm11 = vweird.f32 %v2528_v32 }
 0x84e   :  { %vm1042_vm13 = vmor %vm1040_vm12, %vm1041_vm11 }
 0x84f   :  { %v1036_v1 = vmul.f32 %v2528_v32, %v1035_v63  ;;  %v1033_v43 = vsel %vm1032_vm10, %v2526_v57, %v1029_v28 }
 0x850   :  { %v1044_v6 = vmul.f32 %v1033_v43, %v3123_v35 }
 0x851   :  { %v1037_v2 = vmul.f32 0.5, %v1036_v1 }
 0x852   :  { %v1049_v14 = vmul.f32 %v2472_v5, %v1044_v6 }
 0x853   :  { %v1038_v44 = vsub.f32 1.5, %v1037_v2 }
 0x855   :  { %v1039_v4 = vmul.f32 %v2528_v32, %v1038_v44 }
 0x857   :  { %v1043_v7 = vsel %vm1042_vm13, %v2528_v32, %v1039_v4 }
 0x858   :  { %v1045_v12 = vmul.f32 %v1043_v7, %v3129_v38 }
 0x85a   :  { %v1050_v16 = vmul.f32 %v2472_v5, %v1045_v12 }
 0x85c   :  { %v1051_v17 = vpack.c.bf16 %v1050_v16, %v1049_v14 }
 0x85e   :  { %2206 = vmatmul.msk.bf16.vlgmr.msra.gmra.mxu2 %vm60_vm0, %v1051_v17 }
 0x8e1   :  { %v3154_v18 = vpop.f32.mrf.mxu2 }
 0x8e2   :  { %1152 = vrot.lane.b32.xlu1 %v3154_v18, %s2619_s18  ;;  %1104 = vrot.lane.b32.xlu2 %v3154_v18, %s2620_s19  ;;  %v1166_v63 = vmul.f32 %v3154_v18, %v2831_v11  ;;  %v1414_v6 = vmul.f32 %v3154_v18, %v2857_v31  ;;  %v1376_v16 = vmul.f32 %v3154_v18, %v2875_v40 }
 0x8e9   :  { %v3160_v3 = vpop.f32.mrf.mxu2 }
 0x8ea   :  { %1158 = vrot.lane.b32.xlu2 %v3154_v18, %s2618_s17  ;;  %1160 = vrot.lane.b32.xlu1 %v3160_v3, %s2618_s17  ;;  %v1167_v28 = vmul.f32 %v3160_v3, %v2846_v22  ;;  %v1415_v5 = vmul.f32 %v3160_v3, %v2866_v34  ;;  %v1377_v17 = vmul.f32 %v3160_v3, %v2877_v41 }
 0x8eb   :  { %1106 = vrot.lane.b32.xlu0 %v3160_v3, %s2620_s19 }
 0x8f2   :  { %1408 = vrot.lane.b32.xlu2 %v3160_v3, %s2621_s20  ;;  %1348 = vrot.lane.b32.xlu1 %v3154_v18, %s2623_s22 }
 0x8f3   :  { %1154 = vrot.lane.b32.xlu0 %v3160_v3, %s2619_s18 }
 0x8fa   :  { %1360 = vrot.lane.b32.xlu2 %v3154_v18, %s2622_s21  ;;  %1362 = vrot.lane.b32.xlu1 %v3160_v3, %s2622_s21 }
 0x8fb   :  { %1406 = vrot.lane.b32.xlu0 %v3154_v18, %s2621_s20 }
 0x903   :  { %1350 = vrot.lane.b32.xlu0 %v3160_v3, %s2623_s22 }
 0x93c   :  { %v3182_v0 = vpop.permute.xlu2 %1104 }
 0x93d   :  { %1364 = vrot.lane.b32.xlu1 %v3182_v0, %s2622_s21  ;;  %1352 = vrot.lane.b32.xlu0 %v3182_v0, %s2623_s22 }
 0x944   :  { %v1159_v21 = vpop.permute.xlu2 %1158 }
 0x94c   :  { %v1409_v52 = vpop.permute.xlu2 %1408 }
 0x954   :  { %v1153_v19 = vpop.permute.xlu1 %1152  ;;  %v1361_v33 = vpop.permute.xlu2 %1360 }
 0x955   :  { %v1164_v25 = vsel %vm187_vm8, %v1153_v19, %v1159_v21 }
 0x956   :  { %v1168_v26 = vmul.f32 %v3198_v13, %v1164_v25 }
 0x95c   :  { %v1161_v24 = vpop.permute.xlu1 %1160 }
 0x95d   :  { %v3188_v23 = vpop.permute.xlu0 %1106 }
 0x95e   :  { %1366 = vrot.lane.b32.xlu0 %v3188_v23, %s2622_s21  ;;  %1354 = vrot.lane.b32.xlu2 %v3188_v23, %s2623_s22  ;;  %s3639_s22 = smov 120   ;;  %v1379_v40 = vmul.f32 %v3188_v23, %v2892_v58 }
 0x964   :  { %v1349_v45 = vpop.permute.xlu1 %1348 }
 0x965   :  { %v1155_v27 = vpop.permute.xlu0 %1154  ;;  %v1372_v36 = vsel %vm187_vm8, %v1349_v45, %v1361_v33 }
 0x966   :  { %v1165_v60 = vsel %vm187_vm8, %v1155_v27, %v1161_v24  ;;  %1172 = vrot.lane.b32.xlu2 %v1168_v26, %s2624_s25  ;;  %v1413_v54 = vsel %vm187_vm8, %v1409_v52, %v1155_v27  ;;  %v1380_v48 = vmul.f32 %v3198_v13, %v1372_v36  ;;  %v1378_v52 = vmul.f32 %v3182_v0, %v2890_v56 }
 0x967   :  { %v1169_v51 = vmul.f32 %v3206_v29, %v1165_v60  ;;  %v1417_v37 = vmul.f32 %v3206_v29, %v1413_v54 }
 0x969   :  { %1174 = vrot.lane.b32.xlu1 %v1169_v51, %s2624_s25 }
 0x96c   :  { %v1363_v9 = vpop.permute.xlu1 %1362 }
 0x96d   :  { %v1407_v30 = vpop.permute.xlu0 %1406 }
 0x96e   :  { %v1412_v39 = vsel %vm187_vm8, %v1407_v30, %v1153_v19  ;;  %1422 = vrot.lane.b32.xlu2 %v1417_v37, %s2625_s30 }
 0x96f   :  { %v1416_v42 = vmul.f32 %v3198_v13, %v1412_v39 }
 0x971   :  { %1388 = vrot.lane.b32.xlu1 %v1380_v48, %s2626_s15  ;;  %1420 = vrot.lane.b32.xlu0 %v1416_v42, %s2625_s30  ;;  %s3640_s30 = smov 8   ;;  %v2583_v42 = vld [vmem:[%s3618_s2 + $0x8] sm:$0xff] }
 0x975   :  { %v1351_v46 = vpop.permute.xlu0 %1350 }
 0x976   :  { %v1373_v50 = vsel %vm187_vm8, %v1351_v46, %v1363_v9  ;;  %v1139_v9 = vmul.f32 %v2583_v42, %v3160_v3  ;;  %v2584_v46 = vld [vmem:[%s3618_s2] sm:$0xff] }
 0x977   :  { %v1381_v8 = vmul.f32 %v3206_v29, %v1373_v50  ;;  %v1138_v50 = vmul.f32 %v2584_v46, %v3154_v18 }
 0x979   :  { %1390 = vrot.lane.b32.xlu0 %v1381_v8, %s2626_s15 }
 0x9af   :  { %v1365_v47 = vpop.permute.xlu1 %1364  ;;  %v1353_v49 = vpop.permute.xlu0 %1352 }
 0x9b0   :  { %v1374_v53 = vsel %vm187_vm8, %v1353_v49, %v1365_v47 }
 0x9b1   :  { %v1382_v57 = vmul.f32 %v3226_v55, %v1374_v53 }
 0x9b3   :  { %1392 = vrot.lane.b32.xlu2 %v1382_v57, %s2626_s15 }
 0x9b8   :  { %v1355_v59 = vpop.permute.xlu2 %1354 }
 0x9bb   :  { %1110 = vrot.lane.b32.xlu2 %v3154_v18, %s3639_s22 }
 0x9c0   :  { %v1173_v32 = vpop.permute.xlu2 %1172 }
 0x9c1   :  { %v1178_v2 = vadd.f32 %v1173_v32, %v1166_v63 }
 0x9c3   :  { %1124 = vrot.lane.b32.xlu2 %v3160_v3, %s3640_s30 }
 0x9c8   :  { %v1423_v4 = vpop.permute.xlu2 %1422 }
 0x9c9   :  { %v1427_v7 = vadd.f32 %v1423_v4, %v1415_v5 }
 0x9cb   :  { %1114 = vrot.lane.b32.xlu2 %v3182_v0, %s3639_s22 }
 0x9d0   :  { %v1367_v10 = vpop.permute.xlu0 %1366 }
 0x9d1   :  { %v1375_v61 = vsel %vm187_vm8, %v1355_v59, %v1367_v10 }
 0x9d2   :  { %v1383_v62 = vmul.f32 %v3240_v20, %v1375_v61 }
 0x9d3   :  { %1128 = vrot.lane.b32.xlu2 %v3188_v23, %s3640_s30 }
 0x9d4   :  { %1394 = vrot.lane.b32.xlu1 %v1383_v62, %s2626_s15 }
 0x9db   :  { %v1175_v1 = vpop.permute.xlu1 %1174 }
 0x9dc   :  { %v1179_v43 = vadd.f32 %v1175_v1, %v1167_v28  ;;  %1112 = vrot.lane.b32.xlu1 %v3160_v3, %s3639_s22  ;;  %v2586_v28 = vld [vmem:[%s3618_s2 + $0x10] sm:$0xff] }
 0x9dd   :  { %v1140_v1 = vmul.f32 %v2586_v28, %v3182_v0 }
 0x9de   :  { %v1180_v44 = vpack.c.bf16 %v1179_v43, %v1178_v2 }
 0x9e0   :  { %1183 = vrot.lane.b32.xlu0 %v1180_v44, %s2624_s25  ;;  %s3642_s25 = smov 96  }
 0x9e3   :  { %v1421_v11 = vpop.permute.xlu0 %1420  ;;  %v1389_v14 = vpop.permute.xlu1 %1388 }
 0x9e4   :  { %v1426_v12 = vadd.f32 %v1421_v11, %v1414_v6  ;;  %v1400_v19 = vadd.f32 %v1389_v14, %v1376_v16  ;;  %v2588_v16 = vld [vmem:[%s3617_s1 + $0x8] sm:$0xff] }
 0x9e6   :  { %v1428_v22 = vpack.c.bf16 %v1427_v7, %v1426_v12 }
 0x9e8   :  { %1436 = vrot.lane.b32.xlu1 %v1428_v22, %s3641_s3  ;;  %1122 = vrot.lane.b32.xlu0 %v3154_v18, %s3640_s30 }
 0x9eb   :  { %v1391_v34 = vpop.permute.xlu0 %1390 }
 0x9ec   :  { %v1401_v21 = vadd.f32 %v1391_v34, %v1377_v17 }
 0x9ee   :  { %v1404_v31 = vpack.c.bf16 %v1401_v21, %v1400_v19 }
 0x9f0   :  { %1116 = vrot.lane.b32.xlu1 %v3188_v23, %s3639_s22  ;;  %1431 = vrot.lane.b32.xlu0 %v1404_v31, %s3642_s25 }
 0x9f8   :  { %1126 = vrot.lane.b32.xlu0 %v3182_v0, %s3640_s30 }
 0xa0d   :  { %v1393_v24 = vpop.permute.xlu2 %1392 }
 0xa0e   :  { %v1402_v25 = vadd.f32 %v1393_v24, %v1378_v52 }
 0xa15   :  { %v1111_v26 = vpop.permute.xlu2 %1110 }
 0xa1d   :  { %v1125_v51 = vpop.permute.xlu2 %1124 }
 0xa25   :  { %v1115_v48 = vpop.permute.xlu2 %1114 }
 0xa2d   :  { %v1129_v59 = vpop.permute.xlu2 %1128 }
 0xa46   :  { %v1395_v41 = vpop.permute.xlu1 %1394 }
 0xa47   :  { %v1403_v27 = vadd.f32 %v1395_v41, %v1379_v40  ;;  %v2589_v41 = vld [vmem:[%s3617_s1 + $0x10] sm:$0xff] }
 0xa49   :  { %v1405_v60 = vpack.c.bf16 %v1403_v27, %v1402_v25 }
 0xa4b   :  { %1433 = vrot.lane.b32.xlu1 %v1405_v60, %s3642_s25 }
 0xa4e   :  { %v1113_v45 = vpop.permute.xlu1 %1112 }
 0xa4f   :  { %v1135_v36 = vsel %vm187_vm8, %v1113_v45, %v1125_v51  ;;  %v2590_v45 = vld [vmem:[%s3617_s1 + $0x18] sm:$0xff] }
 0xa50   :  { %v1143_v56 = vmul.f32 %v3206_v29, %v1135_v36 }
 0xa52   :  { %v1184_v54 = vpop.permute.xlu0 %1183  ;;  %v1147_v8 = vadd.f32 %v1143_v56, %v1139_v9 }
 0xa53   :  { %v1192_v33 = vsel %vm247_vm9, %v1184_v54, 0 }
 0xa54   :  { %1201 = vmatpush.bf16.xpose.msra.mxu1 %v1192_v33 }
 0xa5a   :  { %v1437_v37 = vpop.permute.xlu1 %1436  ;;  %v1123_v30 = vpop.permute.xlu0 %1122 }
 0xa5b   :  { %v1445_v58 = vsel %vm247_vm9, %v1437_v37, 0  ;;  %v1134_v39 = vsel %vm187_vm8, %v1111_v26, %v1123_v30 }
 0xa5c   :  { %v1142_v29 = vmul.f32 %v3198_v13, %v1134_v39  ;;  %1454 = vmatpush.bf16.xpose.msrb.mxu2 %v1445_v58  ;;  %v2585_v13 = vld [vmem:[%s3618_s2 + $0x18] sm:$0xff] }
 0xa5d   :  { %v1141_v63 = vmul.f32 %v2585_v13, %v3188_v23  ;;  %v2587_v23 = vld [vmem:[%s3617_s1] sm:$0xff]  ;;  %s3643_s1 = smov 16  }
 0xa5e   :  { %v1146_v47 = vadd.f32 %v1142_v29, %v1138_v50 }
 0xa60   :  { %v1150_v49 = vpack.c.bf16 %v1147_v8, %v1146_v47 }
 0xa62   :  { %v1432_v53 = vpop.permute.xlu0 %1431  ;;  %2207 = vmatmul.msk.bf16.vlgmr.msra.gmra.mxu1 %vm247_vm9, %v1150_v49  ;;  %v1117_v57 = vpop.permute.xlu1 %1116 }
 0xa63   :  { %2211 = vmatmul.msk.bf16.vlgmr.msrb.gmra.mxu2 %vm247_vm9, %v1432_v53  ;;  %v1137_v10 = vsel %vm187_vm8, %v1117_v57, %v1129_v59 }
 0xa64   :  { %v1145_v61 = vmul.f32 %v3240_v20, %v1137_v10 }
 0xa66   :  { %v1149_v43 = vadd.f32 %v1145_v61, %v1141_v63 }
 0xa6a   :  { %v1127_v62 = vpop.permute.xlu0 %1126 }
 0xa6b   :  { %v1136_v32 = vsel %vm187_vm8, %v1115_v48, %v1127_v62 }
 0xa6c   :  { %v1144_v2 = vmul.f32 %v3226_v55, %v1136_v32 }
 0xa6e   :  { %v1148_v44 = vadd.f32 %v1144_v2, %v1140_v1 }
 0xa70   :  { %v1151_v20 = vpack.c.bf16 %v1149_v43, %v1148_v44 }
 0xa72   :  { %2208 = vmatmul.msk.bf16.gmra.mxu1 %vm247_vm9, %v1151_v20 }
 0xabd   :  { %v1434_v4 = vpop.permute.xlu1 %1433 }
 0xabe   :  { %2212 = vmatmul.msk.bf16.gmra.mxu2 %vm247_vm9, %v1434_v4 }
 0xadf   :  { %v1203_v5 = vpop.f32.mrf.mxu1 }
 0xae0   :  { %v1213_v6 = vmul.f32 0.25, %v1203_v5 }
 0xae2   :  { %v1217_v11 = vadd.f32 %v2587_v23, %v1213_v6 }
 0xae4   :  { %v1221_v7 = vsel %vm247_vm9, %v1217_v11, -inf }
 0xae5   :  { %1222 = vmax.xlane.f32.xlu0 %v1221_v7 }
 0xae6   :  { %v1456_v0 = vpop.f32.mrf.mxu2 }
 0xae7   :  { %v1466_v55 = vmul.f32 0.25, %v1456_v0  ;;  %v1205_v12 = vpop.f32.mrf.mxu1 }
 0xae8   :  { %v1214_v22 = vmul.f32 0.25, %v1205_v12  ;;  %v1181_v12 = vpack.c.bf16 %v3160_v3, %v3154_v18 }
 0xae9   :  { %v1470_v14 = vadd.f32 %v2587_v23, %v1466_v55 }
 0xaea   :  { %v1218_v17 = vadd.f32 %v2588_v16, %v1214_v22 }
 0xaeb   :  { %v1474_v34 = vsel %vm247_vm9, %v1470_v14, -inf }
 0xaec   :  { %1475 = vmax.xlane.f32.xlu1 %v1474_v34  ;;  %v1224_v19 = vsel %vm247_vm9, %v1218_v17, -inf }
 0xaed   :  { %1225 = vmax.xlane.f32.xlu2 %v1224_v19 }
 0xaee   :  { %v1458_v21 = vpop.f32.mrf.mxu2 }
 0xaef   :  { %v1467_v31 = vmul.f32 0.25, %v1458_v21  ;;  %v1208_v24 = vpop.f32.mrf.mxu1 }
 0xaf0   :  { %v1215_v52 = vmul.f32 0.25, %v1208_v24 }
 0xaf1   :  { %v1471_v40 = vadd.f32 %v2588_v16, %v1467_v31 }
 0xaf2   :  { %v1219_v25 = vadd.f32 %v2589_v41, %v1215_v52 }
 0xaf3   :  { %v1477_v26 = vsel %vm247_vm9, %v1471_v40, -inf }
 0xaf4   :  { %1478 = vmax.xlane.f32.xlu0 %v1477_v26  ;;  %v1227_v27 = vsel %vm247_vm9, %v1219_v25, -inf }
 0xaf5   :  { %1228 = vmax.xlane.f32.xlu2 %v1227_v27 }
 0xaf7   :  { %v1210_v60 = vpop.f32.mrf.mxu1 }
 0xaf8   :  { %v1216_v51 = vmul.f32 0.25, %v1210_v60 }
 0xafa   :  { %v1220_v54 = vadd.f32 %v2590_v45, %v1216_v51 }
 0xafc   :  { %v1230_v33 = vsel %vm247_vm9, %v1220_v54, -inf }
 0xafd   :  { %1231 = vmax.xlane.f32.xlu1 %v1230_v33 }
 0xb41   :  { %v1461_v36 = vpop.f32.mrf.mxu2 }
 0xb42   :  { %v1468_v56 = vmul.f32 0.25, %v1461_v36 }
 0xb44   :  { %v1472_v37 = vadd.f32 %v2589_v41, %v1468_v56 }
 0xb46   :  { %v1480_v30 = vsel %vm247_vm9, %v1472_v37, -inf }
 0xb47   :  { %1481 = vmax.xlane.f32.xlu0 %v1480_v30 }
 0xb49   :  { %v1463_v58 = vpop.f32.mrf.mxu2 }
 0xb4a   :  { %v1469_v39 = vmul.f32 0.25, %v1463_v58 }
 0xb4c   :  { %v1473_v48 = vadd.f32 %v2590_v45, %v1469_v39 }
 0xb4e   :  { %v1483_v42 = vsel %vm247_vm9, %v1473_v48, -inf }
 0xb4f   :  { %1484 = vmax.xlane.f32.xlu2 %v1483_v42 }
 0xb58   :  { %v1223_v9 = vpop.xlane.xlu0 %1222 }
 0xb59   :  { %v1233_v46 = vsub.f32 %v1217_v11, %v1223_v9 }
 0xb5b   :  { %v1237_v50 = vmul.f32 1.442695, %v1233_v46 }
 0xb5d   :  { %2529 = vpow2.f32 %v1237_v50 }
 0xb5f   :  { %v1476_v29 = vpop.xlane.xlu1 %1475 }
 0xb60   :  { %v1486_v8 = vsub.f32 %v1470_v14, %v1476_v29  ;;  %v1226_v47 = vpop.xlane.xlu2 %1225 }
 0xb61   :  { %v1234_v49 = vsub.f32 %v1218_v17, %v1226_v47 }
 0xb62   :  { %v1490_v53 = vmul.f32 1.442695, %v1486_v8 }
 0xb63   :  { %v3324_v57 = vpop.eup %2529  ;;  %v1239_v59 = vmul.f32 1.442695, %v1234_v49 }
 0xb64   :  { %2531 = vpow2.f32 %v1490_v53  ;;  %v1245_v10 = vsel %vm247_vm9, %v3324_v57, 0.0 }
 0xb65   :  { %2533 = vpow2.f32 %v1239_v59  ;;  %1246 = vadd.xlane.f32.xlu1 %v1245_v10 }
 0xb67   :  { %v1479_v61 = vpop.xlane.xlu0 %1478 }
 0xb68   :  { %v1487_v62 = vsub.f32 %v1471_v40, %v1479_v61  ;;  %v1229_v32 = vpop.xlane.xlu2 %1228 }
 0xb69   :  { %v1235_v13 = vsub.f32 %v1219_v25, %v1229_v32 }
 0xb6a   :  { %v3328_v63 = vpop.eup %2531  ;;  %v1492_v28 = vmul.f32 1.442695, %v1487_v62 }
 0xb6b   :  { %v3330_v1 = vpop.eup %2533  ;;  %v1241_v2 = vmul.f32 1.442695, %v1235_v13  ;;  %v1498_v43 = vsel %vm247_vm9, %v3328_v63, 0.0 }
 0xb6c   :  { %2535 = vpow2.f32 %v1492_v28  ;;  %1499 = vadd.xlane.f32.xlu2 %v1498_v43  ;;  %v1248_v44 = vsel %vm247_vm9, %v3330_v1, 0.0 }
 0xb6d   :  { %2537 = vpow2.f32 %v1241_v2  ;;  %1249 = vadd.xlane.f32.xlu0 %v1248_v44 }
 0xb70   :  { %v1232_v20 = vpop.xlane.xlu1 %1231 }
 0xb71   :  { %v1236_v4 = vsub.f32 %v1220_v54, %v1232_v20 }
 0xb72   :  { %v3336_v5 = vpop.eup %2535 }
 0xb73   :  { %v3338_v6 = vpop.eup %2537  ;;  %v1243_v23 = vmul.f32 1.442695, %v1236_v4  ;;  %v1501_v11 = vsel %vm247_vm9, %v3336_v5, 0.0 }
 0xb74   :  { %1502 = vadd.xlane.f32.xlu1 %v1501_v11  ;;  %v1251_v7 = vsel %vm247_vm9, %v3338_v6, 0.0 }
 0xb75   :  { %2539 = vpow2.f32 %v1243_v23  ;;  %1252 = vadd.xlane.f32.xlu0 %v1251_v7 }
 0xb7b   :  { %v3344_v0 = vpop.eup %2539 }
 0xb7c   :  { %v1254_v55 = vsel %vm247_vm9, %v3344_v0, 0.0 }
 0xb7d   :  { %1255 = vadd.xlane.f32.xlu2 %v1254_v55 }
 0xb8d   :  { %1320 = vrot.lane.b32.xlu1 %v1181_v12, %s2626_s15 }
 0xbba   :  { %v1482_v22 = vpop.xlane.xlu0 %1481 }
 0xbbb   :  { %v1488_v14 = vsub.f32 %v1472_v37, %v1482_v22 }
 0xbbd   :  { %v1494_v16 = vmul.f32 1.442695, %v1488_v14 }
 0xbbf   :  { %2541 = vpow2.f32 %v1494_v16 }
 0xbc2   :  { %v1485_v17 = vpop.xlane.xlu2 %1484 }
 0xbc3   :  { %v1489_v34 = vsub.f32 %v1473_v48, %v1485_v17 }
 0xbc5   :  { %v3351_v19 = vpop.eup %2541  ;;  %v1496_v21 = vmul.f32 1.442695, %v1489_v34 }
 0xbc6   :  { %v1504_v31 = vsel %vm247_vm9, %v3351_v19, 0.0 }
 0xbc7   :  { %2543 = vpow2.f32 %v1496_v21  ;;  %1505 = vadd.xlane.f32.xlu0 %v1504_v31 }
 0xbcd   :  { %v3355_v24 = vpop.eup %2543 }
 0xbce   :  { %v1507_v18 = vsel %vm247_vm9, %v3355_v24, 0.0 }
 0xbcf   :  { %1508 = vadd.xlane.f32.xlu2 %v1507_v18 }
 0xbd8   :  { %v3360_v3 = vpop.xlane.xlu1 %1246 }
 0xbd9   :  { %2545 = vrcp.f32 %v3360_v3  ;;  %vm1262_vm12 = vweird.f32 %v3360_v3  ;;  %v1268_v44 = vand.u32 2147483648, %v3360_v3  ;;  %v1266_v11 = vand.u32 2147483647, %v3360_v3 }
 0xbdb   :  { %1572 = vrot.lane.b32.xlu0 %v1181_v12, %s3643_s1  ;;  %v1269_v18 = vor.u32 1.1754944e-38, %v1268_v44 }
 0xbdf   :  { %v1500_v52 = vpop.xlane.xlu2 %1499  ;;  %v3363_v41 = vpop.eup %2545 }
 0xbe0   :  { %2547 = vrcp.f32 %v1500_v52  ;;  %v1250_v40 = vpop.xlane.xlu0 %1249  ;;  %v1258_v51 = vmul.f32 %v3363_v41, %v3360_v3  ;;  %vm1263_vm14 = vweird.f32 %v3363_v41  ;;  %v1521_v9 = vand.u32 2147483648, %v1500_v52 }
 0xbe1   :  { %2549 = vrcp.f32 %v1250_v40  ;;  %vm1515_vm15 = vweird.f32 %v1500_v52  ;;  %v1519_v50 = vand.u32 2147483647, %v1500_v52  ;;  %vm1277_vm3 = vweird.f32 %v1250_v40 }
 0xbe2   :  { %v1259_v56 = vsub.f32 1.0, %v1258_v51  ;;  %v1522_v62 = vor.u32 1.1754944e-38, %v1521_v9  ;;  %v1281_v32 = vand.u32 2147483647, %v1250_v40  ;;  %v1283_v13 = vand.u32 2147483648, %v1250_v40 }
 0xbe3   :  { %vm1520_vm7 = vcmp.eq.f32.partialorder %v1519_v50, 8.507059e+37 }
 0xbe4   :  { %v1260_v42 = vmul.f32 %v3363_v41, %v1259_v56  ;;  %v1284_v14 = vor.u32 1.1754944e-38, %v1283_v13 }
 0xbe6   :  { %v2548_v25 = vpop.eup %2547  ;;  %v1261_v61 = vadd.f32 %v3363_v41, %v1260_v42 }
 0xbe7   :  { %v3365_v26 = vpop.eup %2549  ;;  %v1511_v27 = vmul.f32 %v2548_v25, %v1500_v52  ;;  %v1503_v60 = vpop.xlane.xlu1 %1502  ;;  %vm1516_vm8 = vweird.f32 %v2548_v25 }
 0xbe8   :  { %v1273_v45 = vmul.f32 %v3365_v26, %v1250_v40  ;;  %2551 = vrcp.f32 %v1503_v60  ;;  %v3370_v37 = vpop.xlane.xlu0 %1252  ;;  %vm3378_vm4 = vmor %vm1515_vm15, %vm1516_vm8  ;;  %vm1278_vm5 = vweird.f32 %v3365_v26  ;;  %v1534_v47 = vand.u32 2147483647, %v1503_v60 }
 0xbe9   :  { %v1512_v54 = vsub.f32 1.0, %v1511_v27  ;;  %2553 = vrcp.f32 %v3370_v37  ;;  %v1536_v49 = vand.u32 2147483648, %v1503_v60  ;;  %vm3389_vm10 = vmor %vm1277_vm3, %vm1278_vm5  ;;  %vm1530_vm11 = vweird.f32 %v1503_v60 }
 0xbea   :  { %v1274_v36 = vsub.f32 1.0, %v1273_v45  ;;  %vm3397_vm8 = vmor %vm1262_vm12, %vm1263_vm14  ;;  %vm1535_vm15 = vcmp.eq.f32.partialorder %v1534_v47, 8.507059e+37  ;;  %vm1282_vm3 = vcmp.eq.f32.partialorder %v1281_v32, 8.507059e+37  ;;  %vm1267_vm14 = vcmp.eq.f32.partialorder %v1266_v11, 8.507059e+37 }
 0xbeb   :  { %v1513_v33 = vmul.f32 %v2548_v25, %v1512_v54  ;;  %v1537_v4 = vor.u32 1.1754944e-38, %v1536_v49  ;;  %v1265_v22 = vsel %vm3397_vm8, %v3363_v41, %v1261_v61 }
 0xbec   :  { %v1275_v39 = vmul.f32 %v3365_v26, %v1274_v36  ;;  %v1298_v36 = vand.u32 2147483648, %v3370_v37 }
 0xbed   :  { %v1514_v58 = vadd.f32 %v2548_v25, %v1513_v33 }
 0xbee   :  { %v2552_v30 = vpop.eup %2551  ;;  %v1276_v59 = vadd.f32 %v3365_v26, %v1275_v39  ;;  %v1299_v39 = vor.u32 1.1754944e-38, %v1298_v36 }
 0xbef   :  { %v1526_v48 = vmul.f32 %v2552_v30, %v1503_v60  ;;  %v1518_v53 = vsel %vm3378_vm4, %v2548_v25, %v1514_v58  ;;  %vm1531_vm6 = vweird.f32 %v2552_v30  ;;  %v2554_v43 = vpop.eup %2553  ;;  %v1270_v25 = vsel %vm1267_vm14, %v1269_v18, %v1265_v22 }
 0xbf0   :  { %v3376_v46 = vpop.xlane.xlu2 %1255  ;;  %v1523_v20 = vsel %vm1520_vm7, %v1522_v62, %v1518_v53  ;;  %vm1532_vm13 = vmor %vm1530_vm11, %vm1531_vm6  ;;  %v1280_v7 = vsel %vm3389_vm10, %v3365_v26, %v1276_v59  ;;  %v1288_v21 = vmul.f32 %v2554_v43, %v3370_v37  ;;  %v1271_v27 = vmul.f32 %v3324_v57, %v1270_v25  ;;  %v2397_v25 = vld [vmem:[%s3622_s6 + $0x30] sm:$0xff] }
 0xbf1   :  { %v1527_v29 = vsub.f32 1.0, %v1526_v48  ;;  %2555 = vrcp.f32 %v3376_v46  ;;  %v1524_v17 = vmul.f32 %v3328_v63, %v1523_v20  ;;  %v1285_v3 = vsel %vm1282_vm3, %v1284_v14, %v1280_v7 }
 0xbf2   :  { %v1286_v26 = vmul.f32 %v3330_v1, %v1285_v3  ;;  %v1289_v41 = vsub.f32 1.0, %v1288_v21  ;;  %v1313_v54 = vand.u32 2147483648, %v3376_v46  ;;  %vm1293_vm5 = vweird.f32 %v2554_v43 }
 0xbf3   :  { %v1528_v10 = vmul.f32 %v2552_v30, %v1527_v29  ;;  %vm1307_vm6 = vweird.f32 %v3376_v46  ;;  %v1311_v1 = vand.u32 2147483647, %v3376_v46  ;;  %vm1292_vm10 = vweird.f32 %v3370_v37 }
 0xbf4   :  { %v1290_v63 = vmul.f32 %v2554_v43, %v1289_v41  ;;  %v1296_v57 = vand.u32 2147483647, %v3370_v37  ;;  %vm1294_vm11 = vmor %vm1292_vm10, %vm1293_vm5  ;;  %v2395_v41 = vld [vmem:[%s3622_s6 + $0x20] sm:$0xff] }
 0xbf5   :  { %v1529_v2 = vadd.f32 %v2552_v30, %v1528_v10  ;;  %vm1312_vm12 = vcmp.eq.f32.partialorder %v1311_v1, 8.507059e+37 }
 0xbf6   :  { %v1291_v33 = vadd.f32 %v2554_v43, %v1290_v63 }
 0xbf7   :  { %v1533_v55 = vsel %vm1532_vm13, %v2552_v30, %v1529_v2  ;;  %v2556_v12 = vpop.eup %2555  ;;  %v1314_v30 = vor.u32 1.1754944e-38, %v1313_v54  ;;  %vm1297_vm13 = vcmp.eq.f32.partialorder %v1296_v57, 8.507059e+37 }
 0xbf8   :  { %v1538_v16 = vsel %vm1535_vm15, %v1537_v4, %v1533_v55  ;;  %v1303_v31 = vmul.f32 %v2556_v12, %v3376_v46  ;;  %vm1308_vm4 = vweird.f32 %v2556_v12  ;;  %v1295_v58 = vsel %vm1294_vm11, %v2554_v43, %v1291_v33 }
 0xbf9   :  { %v1539_v34 = vmul.f32 %v3336_v5, %v1538_v16  ;;  %v1317_v5 = vpack.c.bf16 %v1286_v26, %v1271_v27  ;;  %vm1309_vm7 = vmor %vm1307_vm6, %vm1308_vm4  ;;  %v1300_v42 = vsel %vm1297_vm13, %v1299_v39, %v1295_v58  ;;  %v2396_v26 = vld [vmem:[%s3622_s6 + $0x28] sm:$0xff] }
 0xbfa   :  { %v1304_v52 = vsub.f32 1.0, %v1303_v31  ;;  %v1301_v46 = vmul.f32 %v3338_v6, %v1300_v42 }
 0xbfb   :  { %v1570_v40 = vpack.c.bf16 %v1539_v34, %v1524_v17 }
 0xbfc   :  { %v1305_v60 = vmul.f32 %v2556_v12, %v1304_v52 }
 0xbfe   :  { %v1306_v45 = vadd.f32 %v2556_v12, %v1305_v60 }
 0xbff   :  { %v1321_v51 = vpop.permute.xlu1 %1320 }
 0xc00   :  { %1336 = vmatpush.bf16.msra.mxu3 %v1321_v51  ;;  %v1310_v56 = vsel %vm1309_vm7, %v2556_v12, %v1306_v45 }
 0xc01   :  { %v1315_v48 = vsel %vm1312_vm12, %v1314_v30, %v1310_v56 }
 0xc02   :  { %v1316_v9 = vmul.f32 %v3344_v0, %v1315_v48 }
 0xc03   :  { %2209 = vmatmul.msk.bf16.vlgmr.msra.gmra.mxu3 %vm247_vm9, %v1317_v5 }
 0xc04   :  { %v1318_v50 = vpack.c.bf16 %v1316_v9, %v1301_v46 }
 0xc13   :  { %2210 = vmatmul.msk.bf16.gmra.mxu3 %vm247_vm9, %v1318_v50 }
 0xc3a   :  { %v1506_v29 = vpop.xlane.xlu0 %1505 }
 0xc3b   :  { %2557 = vrcp.f32 %v1506_v29  ;;  %v1551_v2 = vand.u32 2147483648, %v1506_v29  ;;  %vm1545_vm4 = vweird.f32 %v1506_v29  ;;  %v1549_v43 = vand.u32 2147483647, %v1506_v29 }
 0xc3d   :  { %v1552_v23 = vor.u32 1.1754944e-38, %v1551_v2  ;;  %vm1550_vm7 = vcmp.eq.f32.partialorder %v1549_v43, 8.507059e+37  ;;  %v2402_v2 = vld [vmem:[%s3624_s8 + $0x54] sm:$0xf0]  ;;  %v2401_v43 = vld [vmem:[%s3624_s8 + $0x54] sm:$0xf] }
 0xc41   :  { %v2558_v37 = vpop.eup %2557 }
 0xc42   :  { %v1509_v8 = vpop.xlane.xlu2 %1508  ;;  %v1541_v47 = vmul.f32 %v2558_v37, %v1506_v29  ;;  %vm1546_vm15 = vweird.f32 %v2558_v37 }
 0xc43   :  { %2559 = vrcp.f32 %v1509_v8  ;;  %v1566_v6 = vand.u32 2147483648, %v1509_v8  ;;  %vm1560_vm3 = vweird.f32 %v1509_v8  ;;  %v1564_v28 = vand.u32 2147483647, %v1509_v8  ;;  %vm1547_vm5 = vmor %vm1545_vm4, %vm1546_vm15 }
 0xc44   :  { %v1542_v59 = vsub.f32 1.0, %v1541_v47 }
 0xc45   :  { %v1567_v20 = vor.u32 1.1754944e-38, %v1566_v6  ;;  %vm1565_vm6 = vcmp.eq.f32.partialorder %v1564_v28, 8.507059e+37  ;;  %v2269_v6 = vld [vmem:[%s3624_s8 + $0x68] sm:$0xf0]  ;;  %v2259_v28 = vld [vmem:[%s3624_s8 + $0x50] sm:$0xf] }
 0xc46   :  { %v1543_v32 = vmul.f32 %v2558_v37, %v1542_v59  ;;  %v2277_v59 = vld [vmem:[%s3624_s8 + $0x78] sm:$0xf0] }
 0xc48   :  { %v1544_v13 = vadd.f32 %v2558_v37, %v1543_v32  ;;  %v2403_v32 = vld [vmem:[%s3624_s8 + $0x64] sm:$0xf] }
 0xc49   :  { %v2560_v49 = vpop.eup %2559 }
 0xc4a   :  { %v1556_v53 = vmul.f32 %v2560_v49, %v1509_v8  ;;  %vm1561_vm8 = vweird.f32 %v2560_v49  ;;  %v1548_v4 = vsel %vm1547_vm5, %v2558_v37, %v1544_v13  ;;  %v2272_v13 = vor.u32 %v2403_v32, %v2269_v6 }
 0xc4b   :  { %vm1562_vm14 = vmor %vm1560_vm3, %vm1561_vm8  ;;  %v1553_v7 = vsel %vm1550_vm7, %v1552_v23, %v1548_v4 }
 0xc4c   :  { %v1557_v10 = vsub.f32 1.0, %v1556_v53  ;;  %v1554_v12 = vmul.f32 %v3351_v19, %v1553_v7  ;;  %v2398_v19 = vld [vmem:[%s3622_s6 + $0x38] sm:$0xff]  ;;  %v2405_v53 = vld [vmem:[%s3624_s8 + $0x74] sm:$0xf]  ;;  %v2251_v7 = vld [vmem:[%s3624_s8 + $0x40] sm:$0xf] }
 0xc4d   :  { %v1573_v61 = vpop.permute.xlu0 %1572  ;;  %1671 = vmatpush.bf16.msrb.mxu1 %v2398_v19 }
 0xc4e   :  { %v1558_v62 = vmul.f32 %v2560_v49, %v1557_v10  ;;  %1588 = vmatpush.bf16.msrb.mxu0 %v1573_v61  ;;  %v2280_v10 = vor.u32 %v2405_v53, %v2277_v59  ;;  %v2267_v61 = vld [vmem:[%s3624_s8 + $0x60] sm:$0xf] }
 0xc50   :  { %v1559_v0 = vadd.f32 %v2560_v49, %v1558_v62  ;;  %1795 = vmatpush.bf16.msra.mxu2 %v2280_v10  ;;  %v2404_v62 = vld [vmem:[%s3624_s8 + $0x64] sm:$0xf0] }
 0xc51   :  { %2213 = vmatmul.msk.bf16.vlgmr.msrb.gmra.mxu0 %vm247_vm9, %v1570_v40  ;;  %1672 = vmatpush.bf16.msrb.mxu1 %v2397_v25 }
 0xc52   :  { %v1563_v44 = vsel %vm1562_vm14, %v2560_v49, %v1559_v0  ;;  %v2406_v49 = vld [vmem:[%s3624_s8 + $0x74] sm:$0xf0]  ;;  %v2268_v0 = vor.u32 %v2404_v62, %v2267_v61 }
 0xc53   :  { %v1568_v11 = vsel %vm1565_vm6, %v1567_v20, %v1563_v44  ;;  %v2260_v44 = vor.u32 %v2402_v2, %v2259_v28  ;;  %v2261_v20 = vld [vmem:[%s3624_s8 + $0x58] sm:$0xf0] }
 0xc54   :  { %v1569_v55 = vmul.f32 %v3355_v24, %v1568_v11  ;;  %1796 = vmatpush.bf16.msra.mxu2 %v2272_v13  ;;  %v2264_v23 = vor.u32 %v2401_v43, %v2261_v20 }
 0xc55   :  { %1673 = vmatpush.bf16.msrb.mxu1 %v2396_v26 }
 0xc56   :  { %v1571_v22 = vpack.c.bf16 %v1569_v55, %v1554_v12  ;;  %v2400_v55 = vld [vmem:[%s3624_s8 + $0x44] sm:$0xf0]  ;;  %v2399_v12 = vld [vmem:[%s3624_s8 + $0x44] sm:$0xf] }
 0xc58   :  { %1797 = vmatpush.bf16.msra.mxu2 %v2264_v23 }
 0xc59   :  { %1674 = vmatpush.bf16.msrb.mxu1 %v2395_v41 }
 0xc61   :  { %2214 = vmatmul.msk.bf16.gmra.mxu0 %vm247_vm9, %v1571_v22  ;;  %v2252_v22 = vor.u32 %v2400_v55, %v2251_v7 }
 0xc86   :  { %v1338_v14 = vpop.f32.mrf.mxu3 }
 0xc8e   :  { %v1340_v16 = vpop.f32.mrf.mxu3 }
 0xc96   :  { %v1343_v17 = vpop.f32.mrf.mxu3 }
 0xc9e   :  { %v1345_v34 = vpop.f32.mrf.mxu3 }
 0xc9f   :  { %v2455_v21 = vpack.i.bf16 %v1345_v34, %v1343_v17 }
 0xca1   :  { %2456 = vrot.lane.b32.xlu2 %v2455_v21, %s3643_s1 }
 0xcce   :  { %v1590_v31 = vpop.f32.mrf.mxu0 }
 0xcd6   :  { %v1592_v18 = vpop.f32.mrf.mxu0 }
 0xcd7   :  { %v2460_v3 = vpack.i.bf16 %v1592_v18, %v1590_v31 }
 0xcd9   :  { %2461 = vrot.lane.b32.xlu1 %v2460_v3, %s2626_s15 }
 0xcde   :  { %v1595_v52 = vpop.f32.mrf.mxu0 }
 0xce6   :  { %v1597_v40 = vpop.f32.mrf.mxu0 }
 0xce7   :  { %v2465_v24 = vpack.i.bf16 %v1597_v40, %v1595_v52 }
 0xce9   :  { %2466 = vrot.lane.b32.xlu0 %v2465_v24, %s3641_s3 }
 0xcfb   :  { %v2457_v27 = vpop.permute.xlu2 %2456 }
 0xcfc   :  { %v2459_v51 = vunpack.i.h.bf16 %v2457_v27  ;;  %v2458_v63 = vunpack.i.l.bf16 %v2457_v27 }
 0xcfe   :  { %v1625_v33 = vsel %vm247_vm9, %v1340_v16, %v2459_v51  ;;  %v1624_v1 = vsel %vm247_vm9, %v1338_v14, %v2458_v63  ;;  %v2253_v14 = vld [vmem:[%s3624_s8 + $0x48] sm:$0xf0] }
 0xcff   :  { %v2256_v17 = vor.u32 %v2399_v12, %v2253_v14 }
 0xd01   :  { %1798 = vmatpush.bf16.msra.mxu2 %v2256_v17 }
 0xd4b   :  { %v2462_v60 = vpop.permute.xlu1 %2461 }
 0xd4c   :  { %v2464_v5 = vunpack.i.h.bf16 %v2462_v60  ;;  %v2463_v45 = vunpack.i.l.bf16 %v2462_v60 }
 0xd4e   :  { %v1627_v56 = vsel %vm709_vm1, %v1625_v33, %v2464_v5  ;;  %v1626_v30 = vsel %vm709_vm1, %v1624_v1, %v2463_v45  ;;  %v2473_v5 = vld [vmem:[%s3623_s7 + $0x1] ss:$0 sm:$0xff] }
 0xd5b   :  { %v2467_v54 = vpop.permute.xlu0 %2466 }
 0xd5c   :  { %v2469_v36 = vunpack.i.h.bf16 %v2467_v54  ;;  %v2468_v57 = vunpack.i.l.bf16 %v2467_v54 }
 0xd5e   :  { %v1628_v58 = vsel %vm712_vm2, %v1626_v30, %v2468_v57  ;;  %v1629_v39 = vsel %vm712_vm2, %v1627_v56, %v2469_v36  ;;  %v2414_v56 = vld [vmem:[%s3625_s9 + $0x78] sm:$0xff]  ;;  %v2413_v30 = vld [vmem:[%s3625_s9 + $0x70] sm:$0xff] }
 0xd5f   :  { %v1630_v48 = vpack.c.bf16 %v1629_v39, %v1628_v58  ;;  %1913 = vmatpush.bf16.msra.mxu0 %v2414_v56  ;;  %v2412_v58 = vld [vmem:[%s3625_s9 + $0x68] sm:$0xff]  ;;  %v2411_v39 = vld [vmem:[%s3625_s9 + $0x60] sm:$0xff]  ;;  %v2343_v56 = vld [vmem:[%s3627_s11 + $0x10] sm:$0xf] }
 0xd61   :  { %2239 = vmatmul.msk.bf16.vlgmr.msrb.gmra.mxu1 %vm60_vm0, %v1630_v48  ;;  %v2410_v48 = vld [vmem:[%s3625_s9 + $0x58] sm:$0xff] }
 0xd63   :  { %1914 = vmatpush.bf16.msra.mxu0 %v2413_v30  ;;  %v2418_v30 = vld [vmem:[%s3627_s11 + $0x14] sm:$0xf0] }
 0xd67   :  { %1915 = vmatpush.bf16.msra.mxu0 %v2412_v58  ;;  %v2417_v58 = vld [vmem:[%s3627_s11 + $0x14] sm:$0xf] }
 0xd6b   :  { %1916 = vmatpush.bf16.msra.mxu0 %v2411_v39  ;;  %v2344_v39 = vor.u32 %v2418_v30, %v2343_v56 }
 0xd6f   :  { %1917 = vmatpush.bf16.msra.mxu0 %v2410_v48  ;;  %v2345_v48 = vld [vmem:[%s3627_s11 + $0x18] sm:$0xf0] }
 0xdde   :  { %v1676_v42 = vpop.f32.mrf.mxu1 }
 0xddf   :  { %v3451_v9 = vadd.f32 %v1676_v42, %v3123_v35  ;;  %v2275_v35 = vld [vmem:[%s3624_s8 + $0x70] sm:$0xf]  ;;  %s2057_s8 = sshll.u32 %s2632_s5, 4  ;;  %s2058_s8 = int_to_ptr.vmem [resolvable:$true] %s2057_s8 }
 0xde1   :  { %v1685_v46 = vmul.f32 %v3451_v9, %v3451_v9 }
 0xde3   :  { %v1687_v50 = vsel %vm60_vm0, %v1685_v46, 0.0 }
 0xde4   :  { %1688 = vadd.xlane.f32.xlu1 %v1687_v50  ;;  %v2409_v50 = vld [vmem:[%s3625_s9 + $0x50] sm:$0xff] }
 0xde5   :  { %1918 = vmatpush.bf16.msra.mxu0 %v2409_v50 }
 0xde6   :  { %v1678_v29 = vpop.f32.mrf.mxu1 }
 0xde7   :  { %v3457_v8 = vadd.f32 %v1678_v29, %v3129_v38  ;;  %v2276_v38 = vor.u32 %v2406_v49, %v2275_v35  ;;  %v2408_v29 = vld [vmem:[%s3625_s9 + $0x48] sm:$0xff]  ;;  %v2407_v49 = vld [vmem:[%s3625_s9 + $0x40] sm:$0xff] }
 0xde9   :  { %v1686_v37 = vmul.f32 %v3457_v8, %v3457_v8  ;;  %1781 = vmatpush.bf16.msrb.mxu3 %v2276_v38  ;;  %1919 = vmatpush.bf16.msra.mxu0 %v2408_v29  ;;  %v2335_v29 = vld [vmem:[%s3627_s11] sm:$0xf] }
 0xdeb   :  { %v1690_v47 = vsel %vm60_vm0, %v1686_v37, 0.0 }
 0xdec   :  { %1691 = vadd.xlane.f32.xlu2 %v1690_v47 }
 0xded   :  { %1782 = vmatpush.bf16.msrb.mxu3 %v2268_v0  ;;  %1920 = vmatpush.bf16.msra.mxu0 %v2407_v49  ;;  %v2337_v49 = vld [vmem:[%s3627_s11 + $0x8] sm:$0xf0] }
 0xdf1   :  { %1783 = vmatpush.bf16.msrb.mxu3 %v2260_v44 }
 0xdf5   :  { %1784 = vmatpush.bf16.msrb.mxu3 %v2252_v22 }
 0xe57   :  { %v1689_v4 = vpop.xlane.xlu1 %1688 }
 0xe58   :  { %v1693_v11 = vmul.f32 %v1689_v4, %v2716_v15 }
 0xe5a   :  { %v1695_v16 = vadd.f32 1e-05, %v1693_v11 }
 0xe5c   :  { %2561 = vrsqrt.f32 %v1695_v16  ;;  %vm1703_vm1 = vweird.f32 %v1695_v16 }
 0xe5f   :  { %v1692_v34 = vpop.xlane.xlu2 %1691 }
 0xe60   :  { %v1694_v21 = vmul.f32 %v1692_v34, %v2716_v15 }
 0xe62   :  { %v2562_v31 = vpop.eup %2561  ;;  %v1696_v18 = vadd.f32 1e-05, %v1694_v21 }
 0xe63   :  { %v1698_v3 = vmul.f32 %v2562_v31, %v1695_v16  ;;  %vm1704_vm9 = vweird.f32 %v2562_v31 }
 0xe64   :  { %2563 = vrsqrt.f32 %v1696_v18  ;;  %vm1705_vm2 = vmor %vm1703_vm1, %vm1704_vm9  ;;  %vm1713_vm11 = vweird.f32 %v1696_v18 }
 0xe65   :  { %v1699_v52 = vmul.f32 %v2562_v31, %v1698_v3 }
 0xe67   :  { %v1700_v40 = vmul.f32 0.5, %v1699_v52 }
 0xe69   :  { %v1701_v24 = vsub.f32 1.5, %v1700_v40 }
 0xe6a   :  { %v2564_v19 = vpop.eup %2563 }
 0xe6b   :  { %v1708_v25 = vmul.f32 %v2564_v19, %v1696_v18  ;;  %v1702_v26 = vmul.f32 %v2562_v31, %v1701_v24  ;;  %vm1714_vm10 = vweird.f32 %v2564_v19 }
 0xe6c   :  { %vm1715_vm12 = vmor %vm1713_vm11, %vm1714_vm10 }
 0xe6d   :  { %v1709_v41 = vmul.f32 %v2564_v19, %v1708_v25  ;;  %v1706_v60 = vsel %vm1705_vm2, %v2562_v31, %v1702_v26 }
 0xe6e   :  { %v1717_v45 = vmul.f32 %v1706_v60, %v3451_v9  ;;  %v2422_v60 = vld [vmem:[%s3627_s11 + $0x34] sm:$0xf0] }
 0xe6f   :  { %v1710_v27 = vmul.f32 0.5, %v1709_v41 }
 0xe70   :  { %v1722_v1 = vmul.f32 %v2473_v5, %v1717_v45  ;;  %v2351_v45 = vld [vmem:[%s3627_s11 + $0x20] sm:$0xf] }
 0xe71   :  { %v1711_v51 = vsub.f32 1.5, %v1710_v27 }
 0xe73   :  { %v1712_v63 = vmul.f32 %v2564_v19, %v1711_v51  ;;  %v2421_v51 = vld [vmem:[%s3627_s11 + $0x34] sm:$0xf] }
 0xe75   :  { %v1716_v54 = vsel %vm1715_vm12, %v2564_v19, %v1712_v63  ;;  %v2361_v63 = vld [vmem:[%s3627_s11 + $0x38] sm:$0xf0] }
 0xe76   :  { %v1718_v33 = vmul.f32 %v1716_v54, %v3457_v8  ;;  %v2420_v54 = vld [vmem:[%s3627_s11 + $0x24] sm:$0xf0] }
 0xe78   :  { %v1723_v36 = vmul.f32 %v2473_v5, %v1718_v33  ;;  %v2364_v5 = vor.u32 %v2421_v51, %v2361_v63  ;;  %v2419_v33 = vld [vmem:[%s3627_s11 + $0x24] sm:$0xf] }
 0xe7a   :  { %v1724_v57 = vpack.c.bf16 %v1723_v36, %v1722_v1  ;;  %2039 = vmatpush.bf16.msra.mxu3 %v2364_v5  ;;  %v2352_v1 = vor.u32 %v2420_v54, %v2351_v45  ;;  %v2353_v36 = vld [vmem:[%s3627_s11 + $0x28] sm:$0xf0] }
 0xe7c   :  { %2281 = vmatmul.msk.bf16.vlgmr.msrb.gmra.mxu3 %vm60_vm0, %v1724_v57  ;;  %2282 = vmatmul.msk.bf16.vlgmr.msra.gmra.mxu2 %vm60_vm0, %v1724_v57  ;;  %v2356_v57 = vor.u32 %v2419_v33, %v2353_v36 }
 0xe7e   :  { %2040 = vmatpush.bf16.msra.mxu3 %v2356_v57 }
 0xeff   :  { %v1786_v42 = vpop.f32.mrf.mxu3  ;;  %v1800_v43 = vpop.f32.mrf.mxu2 }
 0xf00   :  { %v2283_v46 = vmul.f32 -1.442695, %v1786_v42 }
 0xf02   :  { %2565 = vpow2.f32 %v2283_v46  ;;  %v2348_v46 = vor.u32 %v2417_v58, %v2345_v48 }
 0xf04   :  { %2041 = vmatpush.bf16.msra.mxu3 %v2348_v46 }
 0xf07   :  { %v1788_v37 = vpop.f32.mrf.mxu3  ;;  %v1802_v21 = vpop.f32.mrf.mxu2 }
 0xf08   :  { %v2566_v47 = vpop.eup %2565  ;;  %v2284_v35 = vmul.f32 -1.442695, %v1788_v37 }
 0xf09   :  { %v1811_v53 = vadd.f32 1.0, %v2566_v47  ;;  %v2415_v47 = vld [vmem:[%s3627_s11 + $0x4] sm:$0xf] }
 0xf0a   :  { %2567 = vpow2.f32 %v2284_v35 }
 0xf0b   :  { %2569 = vrcp.f32 %v1811_v53  ;;  %v1824_v13 = vand.u32 2147483648, %v1811_v53  ;;  %vm1818_vm8 = vweird.f32 %v1811_v53  ;;  %v1822_v28 = vand.u32 2147483647, %v1811_v53 }
 0xf0d   :  { %v1825_v4 = vor.u32 1.1754944e-38, %v1824_v13  ;;  %vm1823_vm3 = vcmp.eq.f32.partialorder %v1822_v28, 8.507059e+37 }
 0xf10   :  { %v2568_v38 = vpop.eup %2567 }
 0xf11   :  { %v2570_v59 = vpop.eup %2569  ;;  %v1812_v10 = vadd.f32 1.0, %v2568_v38  ;;  %v2340_v38 = vor.u32 %v2415_v47, %v2337_v49 }
 0xf12   :  { %v1814_v61 = vmul.f32 %v2570_v59, %v1811_v53  ;;  %vm1819_vm13 = vweird.f32 %v2570_v59 }
 0xf13   :  { %2571 = vrcp.f32 %v1812_v10  ;;  %vm1820_vm15 = vmor %vm1818_vm8, %vm1819_vm13  ;;  %v1839_v23 = vand.u32 2147483648, %v1812_v10  ;;  %v1837_v7 = vand.u32 2147483647, %v1812_v10  ;;  %vm1833_vm4 = vweird.f32 %v1812_v10  ;;  %2042 = vmatpush.bf16.msra.mxu3 %v2340_v38 }
 0xf14   :  { %v1815_v62 = vsub.f32 1.0, %v1814_v61 }
 0xf15   :  { %v1840_v22 = vor.u32 1.1754944e-38, %v1839_v23  ;;  %vm1838_vm6 = vcmp.eq.f32.partialorder %v1837_v7, 8.507059e+37 }
 0xf16   :  { %v1816_v32 = vmul.f32 %v2570_v59, %v1815_v62 }
 0xf18   :  { %v1817_v0 = vadd.f32 %v2570_v59, %v1816_v32 }
 0xf19   :  { %v2572_v6 = vpop.eup %2571 }
 0xf1a   :  { %v1829_v2 = vmul.f32 %v2572_v6, %v1812_v10  ;;  %v1821_v44 = vsel %vm1820_vm15, %v2570_v59, %v1817_v0  ;;  %vm1834_vm14 = vweird.f32 %v2572_v6 }
 0xf1b   :  { %v1826_v55 = vsel %vm1823_vm3, %v1825_v4, %v1821_v44  ;;  %vm1835_vm5 = vmor %vm1833_vm4, %vm1834_vm14 }
 0xf1c   :  { %v1830_v20 = vsub.f32 1.0, %v1829_v2  ;;  %v1843_v14 = vmul.f32 %v1826_v55, %v1786_v42 }
 0xf1e   :  { %v1831_v11 = vmul.f32 %v2572_v6, %v1830_v20  ;;  %v1845_v31 = vmul.f32 %v1843_v14, %v1800_v43 }
 0xf20   :  { %v1832_v12 = vadd.f32 %v2572_v6, %v1831_v11 }
 0xf22   :  { %v1836_v16 = vsel %vm1835_vm5, %v2572_v6, %v1832_v12 }
 0xf23   :  { %v1841_v17 = vsel %vm1838_vm6, %v1840_v22, %v1836_v16 }
 0xf24   :  { %v1844_v34 = vmul.f32 %v1841_v17, %v1788_v37  ;;  %v2416_v37 = vld [vmem:[%s3627_s11 + $0x4] sm:$0xf0] }
 0xf25   :  { %v2336_v35 = vor.u32 %v2416_v37, %v2335_v29 }
 0xf26   :  { %v1846_v18 = vmul.f32 %v1844_v34, %v1802_v21 }
 0xf28   :  { %v1847_v3 = vpack.c.bf16 %v1846_v18, %v1845_v31 }
 0xf2a   :  { %1921 = vmatmul.bf16.vlgmr.msra.gmra.mxu0 %v1847_v3 }
 0xfa7   :  { %v1922_v52 = vpop.f32.mrf.mxu0 }
 0xfa8   :  { %v3544_v40 = vadd.f32 %v1922_v52, %v3451_v9  ;;  %v2359_v9 = vld [vmem:[%s3627_s11 + $0x30] sm:$0xf] }
 0xfaa   :  { %v1930_v24 = vmul.f32 %v3544_v40, %v3544_v40 }
 0xfac   :  { %v1932_v19 = vsel %vm60_vm0, %v1930_v24, 0.0 }
 0xfad   :  { %1933 = vadd.xlane.f32.xlu0 %v1932_v19 }
 0xfaf   :  { %v1924_v25 = vpop.f32.mrf.mxu0 }
 0xfb0   :  { %v3550_v26 = vadd.f32 %v1924_v25, %v3457_v8  ;;  %v2360_v8 = vor.u32 %v2422_v60, %v2359_v9 }
 0xfb2   :  { %v1931_v41 = vmul.f32 %v3550_v26, %v3550_v26  ;;  %2025 = vmatpush.bf16.msra.mxu1 %v2360_v8 }
 0xfb4   :  { %v1935_v27 = vsel %vm60_vm0, %v1931_v41, 0.0 }
 0xfb5   :  { %1936 = vadd.xlane.f32.xlu1 %v1935_v27 }
 0xfb6   :  { %2026 = vmatpush.bf16.msra.mxu1 %v2352_v1 }
 0xfba   :  { %2027 = vmatpush.bf16.msra.mxu1 %v2344_v39 }
 0xfbe   :  { %2028 = vmatpush.bf16.msra.mxu1 %v2336_v35 }
0x1020   :  { %v1934_v42 = vpop.xlane.xlu0 %1933 }
0x1021   :  { %v1938_v50 = vmul.f32 %v1934_v42, %v2716_v15 }
0x1023   :  { %v1940_v53 = vadd.f32 1e-05, %v1938_v50 }
0x1025   :  { %2573 = vrsqrt.f32 %v1940_v53  ;;  %vm1948_vm9 = vweird.f32 %v1940_v53 }
0x1028   :  { %v1937_v59 = vpop.xlane.xlu1 %1936 }
0x1029   :  { %v1939_v10 = vmul.f32 %v1937_v59, %v2716_v15  ;;  %v2474_v15 = vld [vmem:[%s3626_s10] ss:$0 sm:$0xff] }
0x102b   :  { %v2574_v61 = vpop.eup %2573  ;;  %v1941_v62 = vadd.f32 1e-05, %v1939_v10 }
0x102c   :  { %v1943_v32 = vmul.f32 %v2574_v61, %v1940_v53  ;;  %vm1949_vm7 = vweird.f32 %v2574_v61 }
0x102d   :  { %2575 = vrsqrt.f32 %v1941_v62  ;;  %vm1950_vm1 = vmor %vm1948_vm9, %vm1949_vm7  ;;  %vm1958_vm10 = vweird.f32 %v1941_v62 }
0x102e   :  { %v1944_v0 = vmul.f32 %v2574_v61, %v1943_v32 }
0x1030   :  { %v1945_v6 = vmul.f32 0.5, %v1944_v0 }
0x1032   :  { %v1946_v13 = vsub.f32 1.5, %v1945_v6 }
0x1033   :  { %v2576_v28 = vpop.eup %2575 }
0x1034   :  { %v1953_v2 = vmul.f32 %v2576_v28, %v1941_v62  ;;  %v1947_v43 = vmul.f32 %v2574_v61, %v1946_v13  ;;  %vm1959_vm2 = vweird.f32 %v2576_v28 }
0x1035   :  { %vm1960_vm11 = vmor %vm1958_vm10, %vm1959_vm2 }
0x1036   :  { %v1954_v44 = vmul.f32 %v2576_v28, %v1953_v2  ;;  %v1951_v4 = vsel %vm1950_vm1, %v2574_v61, %v1947_v43 }
0x1037   :  { %v1962_v7 = vmul.f32 %v1951_v4, %v3544_v40 }
0x1038   :  { %v1955_v20 = vmul.f32 0.5, %v1954_v44 }
0x1039   :  { %v1967_v22 = vmul.f32 %v2474_v15, %v1962_v7 }
0x103a   :  { %v1956_v23 = vsub.f32 1.5, %v1955_v20 }
0x103c   :  { %v1957_v11 = vmul.f32 %v2576_v28, %v1956_v23 }
0x103e   :  { %v1961_v55 = vsel %vm1960_vm11, %v2576_v28, %v1957_v11 }
0x103f   :  { %v1963_v12 = vmul.f32 %v1961_v55, %v3550_v26 }
0x1041   :  { %v1968_v14 = vmul.f32 %v2474_v15, %v1963_v12 }
0x1043   :  { %v1969_v16 = vpack.c.bf16 %v1968_v14, %v1967_v22 }
0x1045   :  { %2365 = vmatmul.msk.bf16.vlgmr.msra.gmra.mxu1 %vm60_vm0, %v1969_v16  ;;  %2366 = vmatmul.msk.bf16.vlgmr.msra.gmra.mxu3 %vm60_vm0, %v1969_v16 }
0x10c2   :  { %v2030_v17 = vpop.f32.mrf.mxu1 }
0x10c3   :  { %2049 = vst [vmem:[#allocation2] sm:$0xff] %v2030_v17 }
0x10c8   :  { %v2044_v34 = vpop.f32.mrf.mxu3 }
0x10c9   :  { %2050 = vst [vmem:[#allocation2 + $0x8] sm:$0xff] %v2044_v34 }
0x10ca   :  { %v2032_v21 = vpop.f32.mrf.mxu1 }
0x10cb   :  { %2051 = vst [vmem:[#allocation2 + $0x10] sm:$0xff] %v2032_v21 }
0x10d0   :  { %v2046_v31 = vpop.f32.mrf.mxu3 }
0x10d1   :  { %2052 = vst [vmem:[#allocation2 + $0x18] sm:$0xff] %v2046_v31 }
0x10d2   :  { %2065 = dma.vmem_to_hbm [thread:$0]  %s2058_s8, 512, %s2060_s24, [#allocation3], %s2633_s23, %s2633_s23, %s3643_s1  }
0x10d3   :  { %2615 = dma.done.wait [#allocation3], 512  }
0x10d4   :  { %2616 = vsyncadd [#allocation3], 4294966784 }
0x10d5   :  { %2070 = vsyncpa [#allocation3], 1 }

</bundles_post_ra>
